<compile_context>
chip_gen: v7x
topology: tpu7x:2x2x1
jax: 0.10.0
libtpu: 0.0.40
codegen_flags: <defaults>
</compile_context>

<pallas_src>
import functools

import jax
import jax.numpy as jnp
from jax.experimental import pallas as pl
from jax.experimental.pallas import tpu as pltpu


_TM_MAX = 512                       # max M-tile rows
_VMEM_LIMIT = 48 * 1024 * 1024      # scoped-VMEM limit (<= 48 MiB, v7x-safe)


def _round_up(x, m):
    return ((x + m - 1) // m) * m


def _pick_tm(M):
    """Pick an M-tile so there are >= 2 tiles whenever M allows it."""
    half = _round_up(max(1, -(-M // 2)), 8)
    return max(8, min(_TM_MAX, half))


# ---------------------------------------------------------------------------
# Kernels.  grid = (Mp // tm,); one full-K GEMM per M-tile, resident weights.
# ---------------------------------------------------------------------------

def _gemm_act_kernel(a_ref, w_ref, b_ref, y_ref, *, act):
    """y = act(A @ W + b) for one (tm, K) x (K, C) tile.  Epilogue in f32."""
    y = jnp.dot(a_ref[...], w_ref[...], preferred_element_type=jnp.float32)
    y = y + b_ref[...]
    if act == "leaky":
        y = jnp.where(y > 0, y, 0.2 * y)              # LeakyReLU(0.2)
    elif act == "sigmoid":
        y = 1.0 / (1.0 + jnp.exp(-y))                 # exp on the EUP
    y_ref[...] = y.astype(y_ref.dtype)


def _gemm_stats_kernel(a_ref, w_ref, b_ref, y_ref, stat_ref, *,
                       tm, m_valid, need_mask):
    """y = A @ W + b plus per-tile partial BN stats (sum, sum-of-squares)."""
    y = jnp.dot(a_ref[...], w_ref[...], preferred_element_type=jnp.float32)
    y = y + b_ref[...]
    y_ref[...] = y.astype(y_ref.dtype)

    ym = y
    if need_mask:  # static Python branch; only emitted when M was padded
        row = (jax.lax.broadcasted_iota(jnp.int32, y.shape, 0)
               + pl.program_id(0) * tm)
        ym = jnp.where(row < m_valid, y, 0.0)
    s = jnp.sum(ym, axis=0, keepdims=True)            # (1, C)
    sq = jnp.sum(ym * ym, axis=0, keepdims=True)      # (1, C)
    stat_ref[...] = jnp.concatenate([s, sq], axis=0).reshape(1, 2, s.shape[-1])


# ---------------------------------------------------------------------------
# pallas_call wrappers
# ---------------------------------------------------------------------------

def _gemm_bias_act(a, w, b, *, tm, act, out_dtype):
    Mp, K = a.shape
    C = w.shape[1]
    kernel = functools.partial(_gemm_act_kernel, act=act)
    return pl.pallas_call(
        kernel,
        out_shape=jax.ShapeDtypeStruct((Mp, C), out_dtype),
        grid=(Mp // tm,),
        in_specs=[
            pl.BlockSpec((tm, K), lambda i: (i, 0)),
            pl.BlockSpec((K, C), lambda i: (0, 0)),    # resident weights
            pl.BlockSpec((1, C), lambda i: (0, 0)),    # resident bias
        ],
        out_specs=pl.BlockSpec((tm, C), lambda i: (i, 0)),
        compiler_params=pltpu.CompilerParams(
            dimension_semantics=("parallel",),
            vmem_limit_bytes=_VMEM_LIMIT),
    )(a, w, b)


def _gemm_bias_stats(a, w, b, *, tm, m_valid, out_dtype):
    Mp, K = a.shape
    C = w.shape[1]
    n_m = Mp // tm
    kernel = functools.partial(_gemm_stats_kernel, tm=tm, m_valid=m_valid,
                               need_mask=(m_valid != Mp))
    return pl.pallas_call(
        kernel,
        out_shape=(jax.ShapeDtypeStruct((Mp, C), out_dtype),
                   jax.ShapeDtypeStruct((n_m, 2, C), jnp.float32)),
        grid=(n_m,),
        in_specs=[
            pl.BlockSpec((tm, K), lambda i: (i, 0)),
            pl.BlockSpec((K, C), lambda i: (0, 0)),
            pl.BlockSpec((1, C), lambda i: (0, 0)),
        ],
        out_specs=(pl.BlockSpec((tm, C), lambda i: (i, 0)),
                   pl.BlockSpec((1, 2, C), lambda i: (i, 0, 0))),
        compiler_params=pltpu.CompilerParams(
            dimension_semantics=("parallel",),
            vmem_limit_bytes=_VMEM_LIMIT),
    )(a, w, b)


# ---------------------------------------------------------------------------
# JAX glue: im2col (NHWC, bf16) and layer assembly
# ---------------------------------------------------------------------------

def _im2col_nhwc(x, k, stride, pad):
    """x: (N, H, W, C) -> patches (N*Ho*Wo, k*k*C), column order (kh, kw, c)."""
    N, H, W, C = x.shape
    if pad:
        x = jnp.pad(x, ((0, 0), (pad, pad), (pad, pad), (0, 0)))
    Ho = (H + 2 * pad - k) // stride + 1
    Wo = (W + 2 * pad - k) // stride + 1
    ih = (jnp.arange(Ho) * stride)[:, None] + jnp.arange(k)[None, :]   # (Ho, k)
    iw = (jnp.arange(Wo) * stride)[:, None] + jnp.arange(k)[None, :]   # (Wo, k)
    p = x[:, ih[:, None, :, None], iw[None, :, None, :], :]            # (N,Ho,Wo,k,k,C)
    return p.reshape(N * Ho * Wo, k * k * C), Ho, Wo


def conv_block(x, w, b, *, stride, pad, bn, act,
               pre_scale=None, pre_shift=None):
    """One Conv2d layer on NHWC bf16 input.

    If pre_scale/pre_shift are given, the previous layer's BatchNorm +
    LeakyReLU(0.2) are applied here elementwise (XLA fuses them into the
    im2col gather, so there is no extra HBM round trip).

    Returns (y_nhwc, scale, shift):
      bn=False: y already has `act` applied; scale/shift are None.
      bn=True : y is the raw conv output (bf16); scale/shift normalize it
                and are consumed by the next layer.
    """
    if pre_scale is not None:
        z = x.astype(jnp.float32) * pre_scale + pre_shift
        x = jnp.where(z > 0, z, 0.2 * z).astype(jnp.bfloat16)

    N = x.shape[0]
    Cout, Cin, k, _ = w.shape
    a, Ho, Wo = _im2col_nhwc(x, k, stride, pad)
    M, K = a.shape

    # Weight (Cout, Cin, kh, kw) -> (kh*kw*Cin, Cout): matches im2col col order.
    wm = jnp.transpose(w, (2, 3, 1, 0)).reshape(K, Cout).astype(jnp.bfloat16)
    bm = b.astype(jnp.float32).reshape(1, Cout)

    tm = _pick_tm(M)
    Mp = _round_up(M, tm)
    if Mp != M:
        a = jnp.pad(a, ((0, Mp - M), (0, 0)))     # bf16 pad, M tail only

    if bn:
        y, stats = _gemm_bias_stats(a, wm, bm, tm=tm, m_valid=M,
                                    out_dtype=jnp.bfloat16)
        s = jnp.sum(stats[:, 0, :], axis=0)
        sq = jnp.sum(stats[:, 1, :], axis=0)
        # nn.BatchNorm2d training-mode batch stats: biased var, eps=1e-5,
        # default affine gamma=1 / beta=0.
        # TODO(synk): eval-mode running statistics are not implemented.
        mean = s / M
        var = jnp.maximum(sq / M - mean * mean, 0.0)
        scale = jax.lax.rsqrt(var + 1e-5)
        shift = -mean * scale
    else:
        out_dtype = jnp.float32 if act == "sigmoid" else jnp.bfloat16
        y = _gemm_bias_act(a, wm, bm, tm=tm, act=act, out_dtype=out_dtype)
        scale = shift = None

    y = y[:M].reshape(N, Ho, Wo, Cout)
    return y, scale, shift


def init_params(key, channels_img, features_d):
    """Deterministic synthetic weights (DCGAN-style N(0, 0.02))."""
    dims = [
        (features_d, channels_img),
        (features_d * 2, features_d),
        (features_d * 4, features_d * 2),
        (features_d * 8, features_d * 4),
        (1, features_d * 8),
    ]
    params = []
    for i, (co, ci) in enumerate(dims):
        kw, kb = jax.random.split(jax.random.fold_in(key, i))
        w = jax.random.normal(kw, (co, ci, 4, 4), jnp.float32) * 0.02
        b = jax.random.normal(kb, (co,), jnp.float32) * 0.02
        params.append((w, b))
    return params


def discriminator_forward(x, params):
    """Mirrors Discriminator.forward (training-mode BatchNorm). x is NCHW."""
    assert tuple(x.shape[2:]) == (64, 64)
    x = jnp.transpose(x, (0, 2, 3, 1)).astype(jnp.bfloat16)   # NCHW -> NHWC once
    (w1, b1), (w2, b2), (w3, b3), (w4, b4), (w5, b5) = params

    x, _, _ = conv_block(x, w1, b1, stride=2, pad=1, bn=False, act="leaky")
    x, sc, sh = conv_block(x, w2, b2, stride=2, pad=1, bn=True, act="leaky")
    x, sc, sh = conv_block(x, w3, b3, stride=2, pad=1, bn=True, act="leaky",
                           pre_scale=sc, pre_shift=sh)
    x, sc, sh = conv_block(x, w4, b4, stride=2, pad=1, bn=True, act="leaky",
                           pre_scale=sc, pre_shift=sh)
    x, _, _ = conv_block(x, w5, b5, stride=2, pad=0, bn=False, act="sigmoid",
                         pre_scale=sc, pre_shift=sh)
    return jnp.transpose(x, (0, 3, 1, 2))   # back to NCHW, float32


if __name__ == "__main__":
    channels_img = 3
    features_d = 4
    batch = 2

    key = jax.random.PRNGKey(0)
    kx, kp = jax.random.split(key)
    x = jax.random.normal(kx, (batch, channels_img, 64, 64), jnp.float32)
    params = init_params(kp, channels_img, features_d)

    fwd = jax.jit(discriminator_forward)
    out = jax.block_until_ready(fwd(x, params))

    assert out.shape == (batch, 1, 1, 1), out.shape
    assert out.dtype == jnp.float32
    assert bool(jnp.all(jnp.isfinite(out)))
    assert bool(jnp.all((out >= 0.0) & (out <= 1.0)))  # sigmoid range
    print("KERNEL_OK")
</pallas_src>

<mosaic_0001>
module attributes {stable_mosaic.version = 11 : i64} {
  func.func @_gemm_act_kernel(%arg0: i32, %arg1: memref<512x48xbf16, #tpu.memory_space<vmem>>, %arg2: memref<48x4xbf16, #tpu.memory_space<vmem>>, %arg3: memref<1x4xf32, #tpu.memory_space<vmem>>, %arg4: memref<512x4xbf16, #tpu.memory_space<vmem>>) attributes {dimension_semantics = [#tpu.dimension_semantics<parallel>], iteration_bounds = array<i64: 4>, scalar_prefetch = 0 : i64, scratch_operands = 0 : i64, tpu.core_type = #tpu.core_type<tc>, window_params = [{transform_indices = @transform_0, window_bounds = array<i64: 512, 48>}, {pipeline_mode = #tpu.pipeline_mode<synchronous>, transform_indices = @transform_1, window_bounds = array<i64: 48, 4>}, {pipeline_mode = #tpu.pipeline_mode<synchronous>, transform_indices = @transform_2, window_bounds = array<i64: 1, 4>}, {transform_indices = @transform_3, window_bounds = array<i64: 512, 4>}]} {
    %c0 = arith.constant 0 : index
    %c0_0 = arith.constant 0 : index
    %0 = vector.load %arg1[%c0, %c0_0] : memref<512x48xbf16, #tpu.memory_space<vmem>>, vector<512x48xbf16>
    %c0_1 = arith.constant 0 : index
    %c0_2 = arith.constant 0 : index
    %1 = vector.load %arg2[%c0_1, %c0_2] : memref<48x4xbf16, #tpu.memory_space<vmem>>, vector<48x4xbf16>
    %cst = arith.constant dense<0.000000e+00> : vector<512x4xf32>
    %2 = tpu.matmul %0, %1, %cst {dimension_numbers = #tpu.dot_dimension_numbers<[1], [0], [0], [1], [0, 0, 1, 1], [], []>} : vector<512x48xbf16>, vector<48x4xbf16>, vector<512x4xf32> -> vector<512x4xf32>
    %c0_3 = arith.constant 0 : index
    %c0_4 = arith.constant 0 : index
    %3 = vector.load %arg3[%c0_3, %c0_4] : memref<1x4xf32, #tpu.memory_space<vmem>>, vector<1x4xf32>
    %4 = vector.broadcast %3 : vector<1x4xf32> to vector<512x4xf32>
    %5 = arith.addf %2, %4 : vector<512x4xf32>
    %cst_5 = arith.constant 0.000000e+00 : f32
    %6 = vector.broadcast %cst_5 : f32 to vector<512x4xf32>
    %7 = arith.cmpf ogt, %5, %6 : vector<512x4xf32>
    %cst_6 = arith.constant 2.000000e-01 : f32
    %8 = vector.broadcast %cst_6 : f32 to vector<512x4xf32>
    %9 = arith.mulf %8, %5 : vector<512x4xf32>
    %10 = arith.select %7, %5, %9 : vector<512x4xi1>, vector<512x4xf32>
    %11 = arith.truncf %10 : vector<512x4xf32> to vector<512x4xbf16>
    %c0_7 = arith.constant 0 : index
    %c0_8 = arith.constant 0 : index
    %12 = vector.load %arg4[%c0_7, %c0_8] : memref<512x4xbf16, #tpu.memory_space<vmem>>, vector<512x4xbf16>
    tpu.vector_store %arg4[%c0_7, %c0_8], %11 {strides = array<i32>} : memref<512x4xbf16, #tpu.memory_space<vmem>>, vector<512x4xbf16>,
    return
  }
  func.func @transform_0(%arg0: i32) -> (i32, i32) {
    %c0_i32 = arith.constant 0 : i32
    %c0_i32_0 = arith.constant 0 : i32
    return %arg0, %c0_i32 : i32, i32
  }
  func.func @transform_1(%arg0: i32) -> (i32, i32) {
    %c0_i32 = arith.constant 0 : i32
    %c0_i32_0 = arith.constant 0 : i32
    %c0_i32_1 = arith.constant 0 : i32
    return %c0_i32, %c0_i32_0 : i32, i32
  }
  func.func @transform_2(%arg0: i32) -> (i32, i32) {
    %c0_i32 = arith.constant 0 : i32
    %c0_i32_0 = arith.constant 0 : i32
    %c0_i32_1 = arith.constant 0 : i32
    return %c0_i32, %c0_i32_0 : i32, i32
  }
  func.func @transform_3(%arg0: i32) -> (i32, i32) {
    %c0_i32 = arith.constant 0 : i32
    %c0_i32_0 = arith.constant 0 : i32
    return %arg0, %c0_i32 : i32, i32
  }
}

module attributes {stable_mosaic.version = 11 : i64} {
  func.func @_gemm_stats_kernel(%arg0: i32, %arg1: memref<256x64xbf16, #tpu.memory_space<vmem>>, %arg2: memref<64x8xbf16, #tpu.memory_space<vmem>>, %arg3: memref<1x8xf32, #tpu.memory_space<vmem>>, %arg4: memref<256x8xbf16, #tpu.memory_space<vmem>>, %arg5: memref<1x2x8xf32, #tpu.memory_space<vmem>>) attributes {dimension_semantics = [#tpu.dimension_semantics<parallel>], iteration_bounds = array<i64: 2>, scalar_prefetch = 0 : i64, scratch_operands = 0 : i64, tpu.core_type = #tpu.core_type<tc>, window_params = [{transform_indices = @transform_0, window_bounds = array<i64: 256, 64>}, {pipeline_mode = #tpu.pipeline_mode<synchronous>, transform_indices = @transform_1, window_bounds = array<i64: 64, 8>}, {pipeline_mode = #tpu.pipeline_mode<synchronous>, transform_indices = @transform_2, window_bounds = array<i64: 1, 8>}, {transform_indices = @transform_3, window_bounds = array<i64: 256, 8>}, {transform_indices = @transform_4, window_bounds = array<i64: 1, 2, 8>}]} {
    %c0 = arith.constant 0 : index
    %c0_0 = arith.constant 0 : index
    %0 = vector.load %arg1[%c0, %c0_0] : memref<256x64xbf16, #tpu.memory_space<vmem>>, vector<256x64xbf16>
    %c0_1 = arith.constant 0 : index
    %c0_2 = arith.constant 0 : index
    %1 = vector.load %arg2[%c0_1, %c0_2] : memref<64x8xbf16, #tpu.memory_space<vmem>>, vector<64x8xbf16>
    %cst = arith.constant dense<0.000000e+00> : vector<256x8xf32>
    %2 = tpu.matmul %0, %1, %cst {dimension_numbers = #tpu.dot_dimension_numbers<[1], [0], [0], [1], [0, 0, 1, 1], [], []>} : vector<256x64xbf16>, vector<64x8xbf16>, vector<256x8xf32> -> vector<256x8xf32>
    %c0_3 = arith.constant 0 : index
    %c0_4 = arith.constant 0 : index
    %3 = vector.load %arg3[%c0_3, %c0_4] : memref<1x8xf32, #tpu.memory_space<vmem>>, vector<1x8xf32>
    %4 = vector.broadcast %3 : vector<1x8xf32> to vector<256x8xf32>
    %5 = arith.addf %2, %4 : vector<256x8xf32>
    %6 = arith.truncf %5 : vector<256x8xf32> to vector<256x8xbf16>
    %c0_5 = arith.constant 0 : index
    %c0_6 = arith.constant 0 : index
    %7 = vector.load %arg4[%c0_5, %c0_6] : memref<256x8xbf16, #tpu.memory_space<vmem>>, vector<256x8xbf16>
    tpu.vector_store %arg4[%c0_5, %c0_6], %6 {strides = array<i32>} : memref<256x8xbf16, #tpu.memory_space<vmem>>, vector<256x8xbf16>,
    %cst_7 = arith.constant dense<0.000000e+00> : vector<8xf32>
    %8 = vector.multi_reduction <add>, %5, %cst_7 [0] : vector<256x8xf32> to vector<8xf32>
    %9 = vector.shape_cast %8 : vector<8xf32> to vector<1x8xf32>
    %10 = arith.mulf %5, %5 : vector<256x8xf32>
    %cst_8 = arith.constant dense<0.000000e+00> : vector<8xf32>
    %11 = vector.multi_reduction <add>, %10, %cst_8 [0] : vector<256x8xf32> to vector<8xf32>
    %12 = vector.shape_cast %11 : vector<8xf32> to vector<1x8xf32>
    %13 = tpu.concatenate %9, %12 in 0 : vector<1x8xf32>, vector<1x8xf32> -> vector<2x8xf32>
    %14 = vector.shape_cast %13 : vector<2x8xf32> to vector<1x2x8xf32>
    %c0_9 = arith.constant 0 : index
    %c0_10 = arith.constant 0 : index
    %c0_11 = arith.constant 0 : index
    %15 = vector.load %arg5[%c0_9, %c0_10, %c0_11] : memref<1x2x8xf32, #tpu.memory_space<vmem>>, vector<1x2x8xf32>
    tpu.vector_store %arg5[%c0_9, %c0_10, %c0_11], %14 {strides = array<i32>} : memref<1x2x8xf32, #tpu.memory_space<vmem>>, vector<1x2x8xf32>,
    return
  }
  func.func @transform_0(%arg0: i32) -> (i32, i32) {
    %c0_i32 = arith.constant 0 : i32
    %c0_i32_0 = arith.constant 0 : i32
    return %arg0, %c0_i32 : i32, i32
  }
  func.func @transform_1(%arg0: i32) -> (i32, i32) {
    %c0_i32 = arith.constant 0 : i32
    %c0_i32_0 = arith.constant 0 : i32
    %c0_i32_1 = arith.constant 0 : i32
    return %c0_i32, %c0_i32_0 : i32, i32
  }
  func.func @transform_2(%arg0: i32) -> (i32, i32) {
    %c0_i32 = arith.constant 0 : i32
    %c0_i32_0 = arith.constant 0 : i32
    %c0_i32_1 = arith.constant 0 : i32
    return %c0_i32, %c0_i32_0 : i32, i32
  }
  func.func @transform_3(%arg0: i32) -> (i32, i32) {
    %c0_i32 = arith.constant 0 : i32
    %c0_i32_0 = arith.constant 0 : i32
    return %arg0, %c0_i32 : i32, i32
  }
  func.func @transform_4(%arg0: i32) -> (i32, i32, i32) {
    %c0_i32 = arith.constant 0 : i32
    %c0_i32_0 = arith.constant 0 : i32
    %c0_i32_1 = arith.constant 0 : i32
    return %arg0, %c0_i32, %c0_i32_0 : i32, i32, i32
  }
}

module attributes {stable_mosaic.version = 11 : i64} {
  func.func @_gemm_stats_kernel(%arg0: i32, %arg1: memref<64x128xbf16, #tpu.memory_space<vmem>>, %arg2: memref<128x16xbf16, #tpu.memory_space<vmem>>, %arg3: memref<1x16xf32, #tpu.memory_space<vmem>>, %arg4: memref<64x16xbf16, #tpu.memory_space<vmem>>, %arg5: memref<1x2x16xf32, #tpu.memory_space<vmem>>) attributes {dimension_semantics = [#tpu.dimension_semantics<parallel>], iteration_bounds = array<i64: 2>, scalar_prefetch = 0 : i64, scratch_operands = 0 : i64, tpu.core_type = #tpu.core_type<tc>, window_params = [{transform_indices = @transform_0, window_bounds = array<i64: 64, 128>}, {pipeline_mode = #tpu.pipeline_mode<synchronous>, transform_indices = @transform_1, window_bounds = array<i64: 128, 16>}, {pipeline_mode = #tpu.pipeline_mode<synchronous>, transform_indices = @transform_2, window_bounds = array<i64: 1, 16>}, {transform_indices = @transform_3, window_bounds = array<i64: 64, 16>}, {transform_indices = @transform_4, window_bounds = array<i64: 1, 2, 16>}]} {
    %c0 = arith.constant 0 : index
    %c0_0 = arith.constant 0 : index
    %0 = vector.load %arg1[%c0, %c0_0] : memref<64x128xbf16, #tpu.memory_space<vmem>>, vector<64x128xbf16>
    %c0_1 = arith.constant 0 : index
    %c0_2 = arith.constant 0 : index
    %1 = vector.load %arg2[%c0_1, %c0_2] : memref<128x16xbf16, #tpu.memory_space<vmem>>, vector<128x16xbf16>
    %cst = arith.constant dense<0.000000e+00> : vector<64x16xf32>
    %2 = tpu.matmul %0, %1, %cst {dimension_numbers = #tpu.dot_dimension_numbers<[1], [0], [0], [1], [0, 0, 1, 1], [], []>} : vector<64x128xbf16>, vector<128x16xbf16>, vector<64x16xf32> -> vector<64x16xf32>
    %c0_3 = arith.constant 0 : index
    %c0_4 = arith.constant 0 : index
    %3 = vector.load %arg3[%c0_3, %c0_4] : memref<1x16xf32, #tpu.memory_space<vmem>>, vector<1x16xf32>
    %4 = vector.broadcast %3 : vector<1x16xf32> to vector<64x16xf32>
    %5 = arith.addf %2, %4 : vector<64x16xf32>
    %6 = arith.truncf %5 : vector<64x16xf32> to vector<64x16xbf16>
    %c0_5 = arith.constant 0 : index
    %c0_6 = arith.constant 0 : index
    %7 = vector.load %arg4[%c0_5, %c0_6] : memref<64x16xbf16, #tpu.memory_space<vmem>>, vector<64x16xbf16>
    tpu.vector_store %arg4[%c0_5, %c0_6], %6 {strides = array<i32>} : memref<64x16xbf16, #tpu.memory_space<vmem>>, vector<64x16xbf16>,
    %cst_7 = arith.constant dense<0.000000e+00> : vector<16xf32>
    %8 = vector.multi_reduction <add>, %5, %cst_7 [0] : vector<64x16xf32> to vector<16xf32>
    %9 = vector.shape_cast %8 : vector<16xf32> to vector<1x16xf32>
    %10 = arith.mulf %5, %5 : vector<64x16xf32>
    %cst_8 = arith.constant dense<0.000000e+00> : vector<16xf32>
    %11 = vector.multi_reduction <add>, %10, %cst_8 [0] : vector<64x16xf32> to vector<16xf32>
    %12 = vector.shape_cast %11 : vector<16xf32> to vector<1x16xf32>
    %13 = tpu.concatenate %9, %12 in 0 : vector<1x16xf32>, vector<1x16xf32> -> vector<2x16xf32>
    %14 = vector.shape_cast %13 : vector<2x16xf32> to vector<1x2x16xf32>
    %c0_9 = arith.constant 0 : index
    %c0_10 = arith.constant 0 : index
    %c0_11 = arith.constant 0 : index
    %15 = vector.load %arg5[%c0_9, %c0_10, %c0_11] : memref<1x2x16xf32, #tpu.memory_space<vmem>>, vector<1x2x16xf32>
    tpu.vector_store %arg5[%c0_9, %c0_10, %c0_11], %14 {strides = array<i32>} : memref<1x2x16xf32, #tpu.memory_space<vmem>>, vector<1x2x16xf32>,
    return
  }
  func.func @transform_0(%arg0: i32) -> (i32, i32) {
    %c0_i32 = arith.constant 0 : i32
    %c0_i32_0 = arith.constant 0 : i32
    return %arg0, %c0_i32 : i32, i32
  }
  func.func @transform_1(%arg0: i32) -> (i32, i32) {
    %c0_i32 = arith.constant 0 : i32
    %c0_i32_0 = arith.constant 0 : i32
    %c0_i32_1 = arith.constant 0 : i32
    return %c0_i32, %c0_i32_0 : i32, i32
  }
  func.func @transform_2(%arg0: i32) -> (i32, i32) {
    %c0_i32 = arith.constant 0 : i32
    %c0_i32_0 = arith.constant 0 : i32
    %c0_i32_1 = arith.constant 0 : i32
    return %c0_i32, %c0_i32_0 : i32, i32
  }
  func.func @transform_3(%arg0: i32) -> (i32, i32) {
    %c0_i32 = arith.constant 0 : i32
    %c0_i32_0 = arith.constant 0 : i32
    return %arg0, %c0_i32 : i32, i32
  }
  func.func @transform_4(%arg0: i32) -> (i32, i32, i32) {
    %c0_i32 = arith.constant 0 : i32
    %c0_i32_0 = arith.constant 0 : i32
    %c0_i32_1 = arith.constant 0 : i32
    return %arg0, %c0_i32, %c0_i32_0 : i32, i32, i32
  }
}

module attributes {stable_mosaic.version = 11 : i64} {
  func.func @_gemm_stats_kernel(%arg0: i32, %arg1: memref<16x256xbf16, #tpu.memory_space<vmem>>, %arg2: memref<256x32xbf16, #tpu.memory_space<vmem>>, %arg3: memref<1x32xf32, #tpu.memory_space<vmem>>, %arg4: memref<16x32xbf16, #tpu.memory_space<vmem>>, %arg5: memref<1x2x32xf32, #tpu.memory_space<vmem>>) attributes {dimension_semantics = [#tpu.dimension_semantics<parallel>], iteration_bounds = array<i64: 2>, scalar_prefetch = 0 : i64, scratch_operands = 0 : i64, tpu.core_type = #tpu.core_type<tc>, window_params = [{transform_indices = @transform_0, window_bounds = array<i64: 16, 256>}, {pipeline_mode = #tpu.pipeline_mode<synchronous>, transform_indices = @transform_1, window_bounds = array<i64: 256, 32>}, {pipeline_mode = #tpu.pipeline_mode<synchronous>, transform_indices = @transform_2, window_bounds = array<i64: 1, 32>}, {transform_indices = @transform_3, window_bounds = array<i64: 16, 32>}, {transform_indices = @transform_4, window_bounds = array<i64: 1, 2, 32>}]} {
    %c0 = arith.constant 0 : index
    %c0_0 = arith.constant 0 : index
    %0 = vector.load %arg1[%c0, %c0_0] : memref<16x256xbf16, #tpu.memory_space<vmem>>, vector<16x256xbf16>
    %c0_1 = arith.constant 0 : index
    %c0_2 = arith.constant 0 : index
    %1 = vector.load %arg2[%c0_1, %c0_2] : memref<256x32xbf16, #tpu.memory_space<vmem>>, vector<256x32xbf16>
    %cst = arith.constant dense<0.000000e+00> : vector<16x32xf32>
    %2 = tpu.matmul %0, %1, %cst {dimension_numbers = #tpu.dot_dimension_numbers<[1], [0], [0], [1], [0, 0, 1, 1], [], []>} : vector<16x256xbf16>, vector<256x32xbf16>, vector<16x32xf32> -> vector<16x32xf32>
    %c0_3 = arith.constant 0 : index
    %c0_4 = arith.constant 0 : index
    %3 = vector.load %arg3[%c0_3, %c0_4] : memref<1x32xf32, #tpu.memory_space<vmem>>, vector<1x32xf32>
    %4 = vector.broadcast %3 : vector<1x32xf32> to vector<16x32xf32>
    %5 = arith.addf %2, %4 : vector<16x32xf32>
    %6 = arith.truncf %5 : vector<16x32xf32> to vector<16x32xbf16>
    %c0_5 = arith.constant 0 : index
    %c0_6 = arith.constant 0 : index
    %7 = vector.load %arg4[%c0_5, %c0_6] : memref<16x32xbf16, #tpu.memory_space<vmem>>, vector<16x32xbf16>
    tpu.vector_store %arg4[%c0_5, %c0_6], %6 {strides = array<i32>} : memref<16x32xbf16, #tpu.memory_space<vmem>>, vector<16x32xbf16>,
    %cst_7 = arith.constant dense<0.000000e+00> : vector<32xf32>
    %8 = vector.multi_reduction <add>, %5, %cst_7 [0] : vector<16x32xf32> to vector<32xf32>
    %9 = vector.shape_cast %8 : vector<32xf32> to vector<1x32xf32>
    %10 = arith.mulf %5, %5 : vector<16x32xf32>
    %cst_8 = arith.constant dense<0.000000e+00> : vector<32xf32>
    %11 = vector.multi_reduction <add>, %10, %cst_8 [0] : vector<16x32xf32> to vector<32xf32>
    %12 = vector.shape_cast %11 : vector<32xf32> to vector<1x32xf32>
    %13 = tpu.concatenate %9, %12 in 0 : vector<1x32xf32>, vector<1x32xf32> -> vector<2x32xf32>
    %14 = vector.shape_cast %13 : vector<2x32xf32> to vector<1x2x32xf32>
    %c0_9 = arith.constant 0 : index
    %c0_10 = arith.constant 0 : index
    %c0_11 = arith.constant 0 : index
    %15 = vector.load %arg5[%c0_9, %c0_10, %c0_11] : memref<1x2x32xf32, #tpu.memory_space<vmem>>, vector<1x2x32xf32>
    tpu.vector_store %arg5[%c0_9, %c0_10, %c0_11], %14 {strides = array<i32>} : memref<1x2x32xf32, #tpu.memory_space<vmem>>, vector<1x2x32xf32>,
    return
  }
  func.func @transform_0(%arg0: i32) -> (i32, i32) {
    %c0_i32 = arith.constant 0 : i32
    %c0_i32_0 = arith.constant 0 : i32
    return %arg0, %c0_i32 : i32, i32
  }
  func.func @transform_1(%arg0: i32) -> (i32, i32) {
    %c0_i32 = arith.constant 0 : i32
    %c0_i32_0 = arith.constant 0 : i32
    %c0_i32_1 = arith.constant 0 : i32
    return %c0_i32, %c0_i32_0 : i32, i32
  }
  func.func @transform_2(%arg0: i32) -> (i32, i32) {
    %c0_i32 = arith.constant 0 : i32
    %c0_i32_0 = arith.constant 0 : i32
    %c0_i32_1 = arith.constant 0 : i32
    return %c0_i32, %c0_i32_0 : i32, i32
  }
  func.func @transform_3(%arg0: i32) -> (i32, i32) {
    %c0_i32 = arith.constant 0 : i32
    %c0_i32_0 = arith.constant 0 : i32
    return %arg0, %c0_i32 : i32, i32
  }
  func.func @transform_4(%arg0: i32) -> (i32, i32, i32) {
    %c0_i32 = arith.constant 0 : i32
    %c0_i32_0 = arith.constant 0 : i32
    %c0_i32_1 = arith.constant 0 : i32
    return %arg0, %c0_i32, %c0_i32_0 : i32, i32, i32
  }
}

module attributes {stable_mosaic.version = 11 : i64} {
  func.func @_gemm_act_kernel(%arg0: i32, %arg1: memref<8x512xbf16, #tpu.memory_space<vmem>>, %arg2: memref<512x1xbf16, #tpu.memory_space<vmem>>, %arg3: memref<1x1xf32, #tpu.memory_space<vmem>>, %arg4: memref<8x1xf32, #tpu.memory_space<vmem>>) attributes {dimension_semantics = [#tpu.dimension_semantics<parallel>], iteration_bounds = array<i64: 1>, scalar_prefetch = 0 : i64, scratch_operands = 0 : i64, tpu.core_type = #tpu.core_type<tc>, window_params = [{transform_indices = @transform_0, window_bounds = array<i64: 8, 512>}, {pipeline_mode = #tpu.pipeline_mode<synchronous>, transform_indices = @transform_1, window_bounds = array<i64: 512, 1>}, {pipeline_mode = #tpu.pipeline_mode<synchronous>, transform_indices = @transform_2, window_bounds = array<i64: 1, 1>}, {transform_indices = @transform_3, window_bounds = array<i64: 8, 1>}]} {
    %c0 = arith.constant 0 : index
    %c0_0 = arith.constant 0 : index
    %0 = vector.load %arg1[%c0, %c0_0] : memref<8x512xbf16, #tpu.memory_space<vmem>>, vector<8x512xbf16>
    %c0_1 = arith.constant 0 : index
    %c0_2 = arith.constant 0 : index
    %1 = vector.load %arg2[%c0_1, %c0_2] : memref<512x1xbf16, #tpu.memory_space<vmem>>, vector<512x1xbf16>
    %cst = arith.constant dense<0.000000e+00> : vector<8x1xf32>
    %2 = tpu.matmul %0, %1, %cst {dimension_numbers = #tpu.dot_dimension_numbers<[1], [0], [0], [1], [0, 0, 1, 1], [], []>} : vector<8x512xbf16>, vector<512x1xbf16>, vector<8x1xf32> -> vector<8x1xf32>
    %c0_3 = arith.constant 0 : index
    %c0_4 = arith.constant 0 : index
    %3 = vector.load %arg3[%c0_3, %c0_4] : memref<1x1xf32, #tpu.memory_space<vmem>>, vector<1x1xf32>
    %4 = vector.broadcast %3 : vector<1x1xf32> to vector<8x1xf32>
    %5 = arith.addf %2, %4 : vector<8x1xf32>
    %cst_5 = arith.constant 0.000000e+00 : f32
    %6 = vector.broadcast %cst_5 : f32 to vector<8x1xf32>
    %7 = arith.subf %6, %5 : vector<8x1xf32>
    %8 = math.exp %7 : vector<8x1xf32>
    %cst_6 = arith.constant 1.000000e+00 : f32
    %9 = vector.broadcast %cst_6 : f32 to vector<8x1xf32>
    %10 = arith.addf %9, %8 : vector<8x1xf32>
    %cst_7 = arith.constant 1.000000e+00 : f32
    %11 = vector.broadcast %cst_7 : f32 to vector<8x1xf32>
    %12 = arith.divf %11, %10 : vector<8x1xf32>
    %c0_8 = arith.constant 0 : index
    %c0_9 = arith.constant 0 : index
    %13 = vector.load %arg4[%c0_8, %c0_9] : memref<8x1xf32, #tpu.memory_space<vmem>>, vector<8x1xf32>
    tpu.vector_store %arg4[%c0_8, %c0_9], %12 {strides = array<i32>} : memref<8x1xf32, #tpu.memory_space<vmem>>, vector<8x1xf32>,
    return
  }
  func.func @transform_0(%arg0: i32) -> (i32, i32) {
    %c0_i32 = arith.constant 0 : i32
    %c0_i32_0 = arith.constant 0 : i32
    return %arg0, %c0_i32 : i32, i32
  }
  func.func @transform_1(%arg0: i32) -> (i32, i32) {
    %c0_i32 = arith.constant 0 : i32
    %c0_i32_0 = arith.constant 0 : i32
    %c0_i32_1 = arith.constant 0 : i32
    return %c0_i32, %c0_i32_0 : i32, i32
  }
  func.func @transform_2(%arg0: i32) -> (i32, i32) {
    %c0_i32 = arith.constant 0 : i32
    %c0_i32_0 = arith.constant 0 : i32
    %c0_i32_1 = arith.constant 0 : i32
    return %c0_i32, %c0_i32_0 : i32, i32
  }
  func.func @transform_3(%arg0: i32) -> (i32, i32) {
    %c0_i32 = arith.constant 0 : i32
    %c0_i32_0 = arith.constant 0 : i32
    return %arg0, %c0_i32 : i32, i32
  }
}

</mosaic_0001>

<bundles_post_ra>
// kernel: discriminator_forward.5
= control target key start
LH: loop header
LB: loop body
LE: loop exit
PB: predicated region body
PF: predicated region fallthrough
CT: control target
= control target key end

     0   :  { %s1774_s12 = smov 0   ;;  %s2151_s0 = inlined_call_operand.vmem [shape: bf16[2048,48], index: 0, kind: input, shape index: {}]   ;;  %s2152_s1 = inlined_call_operand.vmem [shape: bf16[48,4], index: 1, kind: input, shape index: {}]   ;;  %s2153_s2 = inlined_call_operand.vmem [shape: f32[1,4], index: 2, kind: input, shape index: {}]   ;;  %s2154_s3 = inlined_call_operand.vmem [shape: bf16[2048,4], index: 3, kind: output, shape index: {}]  }
   0x1 LB: > { %s1385_s13 = sadd.s32 4294967295, %s1752_s12   ;;  %p1389_p0 = scmp.ge.s32.totalorder %s1752_s12, 1  ;;  %s1752_s12 = sphi %s1774_s12, %s13_s12  }
   0x2   : > { %p138_p1 = scmp.lt.s32.totalorder %s1752_s12, 5 }
   0x4   : > { %p139_p2 = pnand %p1389_p0, %p138_p1 }
   0x5   : > { %v1711_v0 = vld [vmem:[%s2152_s1] sm:$0xff] (!%p139_p2)   ;;  %s1390_s16 = sshll.u32 (!%p139_p2), %s1385_s13, 6  ;;  %v1712_v1 = vld [vmem:[%s2152_s1 + $0x8] sm:$0xff] (!%p139_p2)   ;;  %v1713_v2 = vld [vmem:[%s2152_s1 + $0x10] sm:$0xff] (!%p139_p2)   ;;  %vm430_vm0 = vcmask (!%p139_p2), 392192   ;;  %vm1264_vm1 = vcmask (!%p139_p2), 27648  }
   0x6   : > { %142 = sbr.rel (%p139_p2) target bundleno = 316 (0x13c), region = 32  ;;  %p163_p3 = scmp.lt.s32.totalorder (!%p139_p2), %s1390_s16, 255  ;;  %1627 = vmatprep.subr.bf16.mxu0 (!%p139_p2), %v1711_v0  ;;  %1697 = vmatprep.subr.bf16.mxu1 (!%p139_p2), %v1711_v0  ;;  %v1868_v35 = vld [vmem:[%s2153_s2] ss:$0 sm:$0xff] (!%p139_p2) }
   0x7   : > { %1628 = vmatpush3.bf16.msra.mxu0 (!%p139_p2), %v1711_v0  ;;  %1700 = vmatpush3.bf16.msra.mxu1 (!%p139_p2), %v1711_v0 }
   0x8   : > { %1629 = vmatprep.subr.bf16.mxu0 (!%p139_p2), %v1712_v1  ;;  %1698 = vmatprep.subr.bf16.mxu1 (!%p139_p2), %v1712_v1 }
   0xb   : > { %1630 = vmatpush3.bf16.msra.mxu0 (!%p139_p2), %v1712_v1  ;;  %1701 = vmatpush3.bf16.msra.mxu1 (!%p139_p2), %v1712_v1 }
   0xc   : > { %1631 = vmatprep.subr.bf16.mxu0 (!%p139_p2), %v1713_v2  ;;  %1699 = vmatprep.subr.bf16.mxu1 (!%p139_p2), %v1713_v2 }
   0xd   : > { %s2156_s16 = smov (!%p163_p3, %s1390_s16), 255 }
   0xe   : > { %s1391_s21 = sshll.u32 %s2156_s16, 2 }
   0xf   : > { %s1799_s24 = scalar_lea.vmem %s2151_s0, %s1391_s21  ;;  %1632 = vmatpush3.bf16.msra.mxu0 %v1713_v2  ;;  %1702 = vmatpush3.bf16.msra.mxu1 %v1713_v2  ;;  %s1879_s29 = scalar_lea.vmem %s2154_s3, %s1391_s21 }
  0x10   : > { %v1714_v3 = vld [vmem:[%s1799_s24] sm:$0xff]   ;;  %v1716_v5 = vld [vmem:[%s1799_s24 + $0x8] sm:$0xff]   ;;  %v1718_v7 = vld [vmem:[%s1799_s24 + $0x10] sm:$0xff]  }
  0x11   : > { %v1715_v4 = vld [vmem:[%s1799_s24 + $0x80] sm:$0xff]   ;;  %1633 = vmatprep.mubr.msk.bf16.mxu0 %vm430_vm0, %v1714_v3  ;;  %v1717_v6 = vld [vmem:[%s1799_s24 + $0x88] sm:$0xff]   ;;  %v1719_v8 = vld [vmem:[%s1799_s24 + $0x90] sm:$0xff]  }
  0x12   : > { %1665 = vmatprep.mubr.msk.bf16.mxu1 %vm430_vm0, %v1715_v4  ;;  %1634 = vmatmul.mubr.msk.bf16.vlgmr.msra.gmra.mrb[0].mxu0 %vm430_vm0, %v1716_v5  ;;  %v1720_v9 = vld [vmem:[%s1799_s24 + $0x18] sm:$0xff]   ;;  %v1722_v11 = vld [vmem:[%s1799_s24 + $0x20] sm:$0xff]   ;;  %v1724_v13 = vld [vmem:[%s1799_s24 + $0x28] sm:$0xff]  }
  0x13   : > { %1666 = vmatmul.mubr.msk.bf16.vlgmr.msra.gmra.mrb[0].mxu1 %vm430_vm0, %v1717_v6  ;;  %1637 = vmatprep.mubr.msk.bf16.mxu0 %vm430_vm0, %v1718_v7  ;;  %v1721_v10 = vld [vmem:[%s1799_s24 + $0x98] sm:$0xff]   ;;  %v1723_v12 = vld [vmem:[%s1799_s24 + $0xa0] sm:$0xff]   ;;  %v1725_v14 = vld [vmem:[%s1799_s24 + $0xa8] sm:$0xff]  }
  0x14   : > { %1669 = vmatprep.mubr.msk.bf16.mxu1 %vm430_vm0, %v1719_v8  ;;  %v1726_v15 = vld [vmem:[%s1799_s24 + $0x30] sm:$0xff]   ;;  %v1728_v17 = vld [vmem:[%s1799_s24 + $0x38] sm:$0xff]   ;;  %v1730_v19 = vld [vmem:[%s1799_s24 + $0x40] sm:$0xff]  }
  0x15   : > { %v1727_v16 = vld [vmem:[%s1799_s24 + $0xb0] sm:$0xff]   ;;  %v1729_v18 = vld [vmem:[%s1799_s24 + $0xb8] sm:$0xff]   ;;  %v1731_v20 = vld [vmem:[%s1799_s24 + $0xc0] sm:$0xff]  }
  0x16   : > { %v1732_v21 = vld [vmem:[%s1799_s24 + $0x48] sm:$0xff]   ;;  %v1734_v23 = vld [vmem:[%s1799_s24 + $0x50] sm:$0xff]   ;;  %v1736_v25 = vld [vmem:[%s1799_s24 + $0x58] sm:$0xff]  }
  0x17   : > { %v1733_v22 = vld [vmem:[%s1799_s24 + $0xc8] sm:$0xff]   ;;  %v1735_v24 = vld [vmem:[%s1799_s24 + $0xd0] sm:$0xff]   ;;  %v1737_v26 = vld [vmem:[%s1799_s24 + $0xd8] sm:$0xff]  }
  0x18   : > { %v1738_v27 = vld [vmem:[%s1799_s24 + $0x60] sm:$0xff]   ;;  %v1740_v29 = vld [vmem:[%s1799_s24 + $0x68] sm:$0xff]   ;;  %v1742_v31 = vld [vmem:[%s1799_s24 + $0x70] sm:$0xff]  }
  0x19   : > { %v1739_v28 = vld [vmem:[%s1799_s24 + $0xe0] sm:$0xff]   ;;  %v1741_v30 = vld [vmem:[%s1799_s24 + $0xe8] sm:$0xff]   ;;  %v1743_v32 = vld [vmem:[%s1799_s24 + $0xf0] sm:$0xff]  }
  0x1a   : > { %1638 = vmatmul.mubr.msk.bf16.gmra.mrb[4].mxu0 %vm430_vm0, %v1720_v9  ;;  %v1744_v33 = vld [vmem:[%s1799_s24 + $0x78] sm:$0xff]  }
  0x1b   : > { %1670 = vmatmul.mubr.msk.bf16.gmra.mrb[4].mxu1 %vm430_vm0, %v1721_v10  ;;  %1641 = vmatprep.mubr.msk.bf16.mxu0 %vm430_vm0, %v1722_v11  ;;  %v1745_v34 = vld [vmem:[%s1799_s24 + $0xf8] sm:$0xff]  }
  0x1c   : > { %1673 = vmatprep.mubr.msk.bf16.mxu1 %vm430_vm0, %v1723_v12 }
  0x22   : > { %1642 = vmatmul.mubr.msk.bf16.gmra.mrb[8].mxu0 %vm430_vm0, %v1724_v13 }
  0x23   : > { %1674 = vmatmul.mubr.msk.bf16.gmra.mrb[8].mxu1 %vm430_vm0, %v1725_v14  ;;  %1645 = vmatprep.mubr.msk.bf16.mxu0 %vm430_vm0, %v1726_v15 }
  0x24   : > { %1677 = vmatprep.mubr.msk.bf16.mxu1 %vm430_vm0, %v1727_v16 }
  0x2a   : > { %1646 = vmatmul.mubr.msk.bf16.gmra.mrb[12].mxu0 %vm430_vm0, %v1728_v17 }
  0x2b   : > { %1678 = vmatmul.mubr.msk.bf16.gmra.mrb[12].mxu1 %vm430_vm0, %v1729_v18  ;;  %1649 = vmatprep.mubr.msk.bf16.mxu0 %vm430_vm0, %v1730_v19 }
  0x2c   : > { %1681 = vmatprep.mubr.msk.bf16.mxu1 %vm430_vm0, %v1731_v20 }
  0x32   : > { %1650 = vmatmul.mubr.msk.bf16.gmra.mrb[16].mxu0 %vm430_vm0, %v1732_v21 }
  0x33   : > { %1682 = vmatmul.mubr.msk.bf16.gmra.mrb[16].mxu1 %vm430_vm0, %v1733_v22  ;;  %1653 = vmatprep.mubr.msk.bf16.mxu0 %vm430_vm0, %v1734_v23 }
  0x34   : > { %1685 = vmatprep.mubr.msk.bf16.mxu1 %vm430_vm0, %v1735_v24 }
  0x3a   : > { %1654 = vmatmul.mubr.msk.bf16.gmra.mrb[20].mxu0 %vm430_vm0, %v1736_v25 }
  0x3b   : > { %1686 = vmatmul.mubr.msk.bf16.gmra.mrb[20].mxu1 %vm430_vm0, %v1737_v26  ;;  %1657 = vmatprep.mubr.msk.bf16.mxu0 %vm430_vm0, %v1738_v27 }
  0x3c   : > { %1689 = vmatprep.mubr.msk.bf16.mxu1 %vm430_vm0, %v1739_v28 }
  0x42   : > { %1658 = vmatmul.mubr.msk.bf16.gmra.mrb[24].mxu0 %vm430_vm0, %v1740_v29 }
  0x43   : > { %1690 = vmatmul.mubr.msk.bf16.gmra.mrb[24].mxu1 %vm430_vm0, %v1741_v30  ;;  %1661 = vmatprep.mubr.msk.bf16.mxu0 %vm430_vm0, %v1742_v31 }
  0x44   : > { %1693 = vmatprep.mubr.msk.bf16.mxu1 %vm430_vm0, %v1743_v32 }
  0x4a   : > { %1662 = vmatmul.mubr.msk.bf16.gmra.mrb[28].mxu0 %vm430_vm0, %v1744_v33 }
  0x4b   : > { %1694 = vmatmul.mubr.msk.bf16.gmra.mrb[28].mxu1 %vm430_vm0, %v1745_v34 }
  0xe5   : > { %v1635_v36 = vpop.f32.mrb[0].mxu0 }
  0xe6   : > { %v1667_v37 = vpop.f32.mrb[0].mxu1  ;;  %v570_v38 = vadd.f32 %v1635_v36, %v1868_v35  ;;  %v561_v40 = vpop.f32.mrb[1].mxu0 }
  0xe7   : > { %v698_v39 = vadd.f32 %v1667_v37, %v1868_v35  ;;  %v689_v41 = vpop.f32.mrb[1].mxu1  ;;  %v562_v42 = vadd.f32 %v1868_v35, %v561_v40  ;;  %v1636_v44 = vpop.f32.mrb[2].mxu0 }
  0xe8   : > { %v690_v43 = vadd.f32 %v1868_v35, %v689_v41  ;;  %v1668_v45 = vpop.f32.mrb[2].mxu1  ;;  %vm818_vm2 = vcmp.gt.f32.partialorder %v570_v38, 0.0  ;;  %v882_v46 = vmul.f32 0.2, %v570_v38  ;;  %v573_v52 = vadd.f32 %v1636_v44, %v1868_v35  ;;  %v564_v54 = vpop.f32.mrb[3].mxu0 }
  0xe9   : > { %vm850_vm3 = vcmp.gt.f32.partialorder %v698_v39, 0.0  ;;  %v914_v47 = vmul.f32 0.2, %v698_v39  ;;  %vm816_vm4 = vcmp.gt.f32.partialorder %v562_v42, 0.0  ;;  %v880_v48 = vmul.f32 0.2, %v562_v42 }
  0xea   : > { %vm848_vm5 = vcmp.gt.f32.partialorder %v690_v43, 0.0  ;;  %v912_v49 = vmul.f32 0.2, %v690_v43  ;;  %v946_v50 = vsel %vm818_vm2, %v570_v38, %v882_v46  ;;  %v701_v53 = vadd.f32 %v1668_v45, %v1868_v35  ;;  %v692_v55 = vpop.f32.mrb[3].mxu1 }
  0xeb   : > { %v978_v51 = vsel %vm850_vm3, %v698_v39, %v914_v47  ;;  %v1530_v56 = vpack.c.bf16 %v946_v50, %v946_v50  ;;  %v944_v58 = vsel %vm816_vm4, %v562_v42, %v880_v48  ;;  %vm819_vm6 = vcmp.gt.f32.partialorder %v573_v52, 0.0 }
  0xec   : > { %v1562_v57 = vpack.c.bf16 %v978_v51, %v978_v51  ;;  %v976_v59 = vsel %vm848_vm5, %v690_v43, %v912_v49  ;;  %v1528_v60 = vpack.c.bf16 %v944_v58, %v944_v58  ;;  %v883_v62 = vmul.f32 0.2, %v573_v52 }
  0xed   : > { %v1560_v61 = vpack.c.bf16 %v976_v59, %v976_v59  ;;  %1267 = vst.msk [vmem:[%s1879_s29 + $0x8] sm:$0xf] %vm1264_vm1, %v1530_v56  ;;  %vm851_vm7 = vcmp.gt.f32.partialorder %v701_v53, 0.0  ;;  %v915_v63 = vmul.f32 0.2, %v701_v53  ;;  %v565_v0 = vadd.f32 %v1868_v35, %v564_v54  ;;  %v1639_v2 = vpop.f32.mrb[4].mxu0 }
  0xee   : > { %1299 = vst.msk [vmem:[%s1879_s29 + $0x88] sm:$0xf] %vm1264_vm1, %v1562_v57  ;;  %v693_v1 = vadd.f32 %v1868_v35, %v692_v55  ;;  %v1671_v3 = vpop.f32.mrb[4].mxu1  ;;  %1265 = vst.msk [vmem:[%s1879_s29] sm:$0xf] %vm1264_vm1, %v1528_v60  ;;  %v947_v4 = vsel %vm819_vm6, %v573_v52, %v883_v62  ;;  %v586_v5 = vadd.f32 %v1639_v2, %v1868_v35  ;;  %v577_v7 = vpop.f32.mrb[5].mxu0 }
  0xef   : > { %1297 = vst.msk [vmem:[%s1879_s29 + $0x80] sm:$0xf] %vm1264_vm1, %v1560_v61  ;;  %v714_v6 = vadd.f32 %v1671_v3, %v1868_v35  ;;  %v705_v8 = vpop.f32.mrb[5].mxu1  ;;  %v1531_v9 = vpack.c.bf16 %v947_v4, %v947_v4  ;;  %v979_v10 = vsel %vm851_vm7, %v701_v53, %v915_v63  ;;  %vm817_vm8 = vcmp.gt.f32.partialorder %v565_v0, 0.0  ;;  %v1640_v12 = vpop.f32.mrb[6].mxu0 }
  0xf0   : > { %v881_v11 = vmul.f32 0.2, %v565_v0  ;;  %v1672_v13 = vpop.f32.mrb[6].mxu1  ;;  %v1563_v14 = vpack.c.bf16 %v979_v10, %v979_v10  ;;  %vm849_vm9 = vcmp.gt.f32.partialorder %v693_v1, 0.0  ;;  %v913_v15 = vmul.f32 0.2, %v693_v1 }
  0xf1   : > { %vm822_vm10 = vcmp.gt.f32.partialorder %v586_v5, 0.0  ;;  %v580_v16 = vpop.f32.mrb[7].mxu0  ;;  %v708_v17 = vpop.f32.mrb[7].mxu1  ;;  %1268 = vst.msk [vmem:[%s1879_s29 + $0xc] sm:$0xf] %vm1264_vm1, %v1531_v9  ;;  %vm854_vm11 = vcmp.gt.f32.partialorder %v714_v6, 0.0  ;;  %v578_v23 = vadd.f32 %v1868_v35, %v577_v7  ;;  %v706_v24 = vadd.f32 %v1868_v35, %v705_v8 }
  0xf2   : > { %v945_v18 = vsel %vm817_vm8, %v565_v0, %v881_v11  ;;  %v886_v19 = vmul.f32 0.2, %v586_v5  ;;  %v918_v20 = vmul.f32 0.2, %v714_v6  ;;  %1300 = vst.msk [vmem:[%s1879_s29 + $0x8c] sm:$0xf] %vm1264_vm1, %v1563_v14  ;;  %v977_v22 = vsel %vm849_vm9, %v693_v1, %v913_v15 }
  0xf3   : > { %v1529_v21 = vpack.c.bf16 %v945_v18, %v945_v18  ;;  %v1561_v25 = vpack.c.bf16 %v977_v22, %v977_v22  ;;  %v589_v28 = vadd.f32 %v1640_v12, %v1868_v35  ;;  %vm820_vm12 = vcmp.gt.f32.partialorder %v578_v23, 0.0 }
  0xf4   : > { %v950_v26 = vsel %vm822_vm10, %v586_v5, %v886_v19  ;;  %v982_v27 = vsel %vm854_vm11, %v714_v6, %v918_v20  ;;  %v884_v31 = vmul.f32 0.2, %v578_v23  ;;  %vm852_vm13 = vcmp.gt.f32.partialorder %v706_v24, 0.0 }
  0xf5   : > { %1266 = vst.msk [vmem:[%s1879_s29 + $0x4] sm:$0xf] %vm1264_vm1, %v1529_v21  ;;  %v1534_v29 = vpack.c.bf16 %v950_v26, %v950_v26  ;;  %v1566_v30 = vpack.c.bf16 %v982_v27, %v982_v27  ;;  %1298 = vst.msk [vmem:[%s1879_s29 + $0x84] sm:$0xf] %vm1264_vm1, %v1561_v25  ;;  %v916_v32 = vmul.f32 0.2, %v706_v24  ;;  %v717_v36 = vadd.f32 %v1672_v13, %v1868_v35 }
  0xf6   : > { %vm823_vm14 = vcmp.gt.f32.partialorder %v589_v28, 0.0  ;;  %v887_v33 = vmul.f32 0.2, %v589_v28  ;;  %v948_v34 = vsel %vm820_vm12, %v578_v23, %v884_v31  ;;  %v581_v37 = vadd.f32 %v1868_v35, %v580_v16  ;;  %v1643_v39 = vpop.f32.mrb[8].mxu0  ;;  %v1675_v40 = vpop.f32.mrb[8].mxu1 }
  0xf7   : > { %1271 = vst.msk [vmem:[%s1879_s29 + $0x18] sm:$0xf] %vm1264_vm1, %v1534_v29  ;;  %1303 = vst.msk [vmem:[%s1879_s29 + $0x98] sm:$0xf] %vm1264_vm1, %v1566_v30  ;;  %v709_v38 = vadd.f32 %v1868_v35, %v708_v17  ;;  %v1532_v41 = vpack.c.bf16 %v948_v34, %v948_v34  ;;  %v980_v42 = vsel %vm852_vm13, %v706_v24, %v916_v32  ;;  %v593_v45 = vpop.f32.mrb[9].mxu0  ;;  %v721_v46 = vpop.f32.mrb[9].mxu1 }
  0xf8   : > { %v951_v43 = vsel %vm823_vm14, %v589_v28, %v887_v33  ;;  %v602_v44 = vadd.f32 %v1643_v39, %v1868_v35  ;;  %v1564_v47 = vpack.c.bf16 %v980_v42, %v980_v42  ;;  %vm855_vm15 = vcmp.gt.f32.partialorder %v717_v36, 0.0  ;;  %v1644_v50 = vpop.f32.mrb[10].mxu0  ;;  %v1676_v51 = vpop.f32.mrb[10].mxu1 }
  0xf9   : > { %v1535_v48 = vpack.c.bf16 %v951_v43, %v951_v43  ;;  %v919_v49 = vmul.f32 0.2, %v717_v36  ;;  %1269 = vst.msk [vmem:[%s1879_s29 + $0x10] sm:$0xf] %vm1264_vm1, %v1532_v41  ;;  %vm821_vm0 = vcmp.gt.f32.partialorder %v581_v37, 0.0  ;;  %vm853_vm2 = vcmp.gt.f32.partialorder %v709_v38, 0.0 }
  0xfa   : > { %v885_v52 = vmul.f32 0.2, %v581_v37  ;;  %v917_v53 = vmul.f32 0.2, %v709_v38  ;;  %1301 = vst.msk [vmem:[%s1879_s29 + $0x90] sm:$0xf] %vm1264_vm1, %v1564_v47  ;;  %v730_v56 = vadd.f32 %v1675_v40, %v1868_v35  ;;  %v594_v62 = vadd.f32 %v1868_v35, %v593_v45 }
  0xfb   : > { %1272 = vst.msk [vmem:[%s1879_s29 + $0x1c] sm:$0xf] %vm1264_vm1, %v1535_v48  ;;  %v983_v54 = vsel %vm855_vm15, %v717_v36, %v919_v49  ;;  %vm826_vm3 = vcmp.gt.f32.partialorder %v602_v44, 0.0  ;;  %v890_v55 = vmul.f32 0.2, %v602_v44  ;;  %v596_v57 = vpop.f32.mrb[11].mxu0  ;;  %v722_v6 = vadd.f32 %v1868_v35, %v721_v46 }
  0xfc   : > { %v724_v58 = vpop.f32.mrb[11].mxu1  ;;  %v1567_v59 = vpack.c.bf16 %v983_v54, %v983_v54  ;;  %v949_v60 = vsel %vm821_vm0, %v581_v37, %v885_v52  ;;  %v981_v61 = vsel %vm853_vm2, %v709_v38, %v917_v53  ;;  %vm858_vm4 = vcmp.gt.f32.partialorder %v730_v56, 0.0 }
  0xfd   : > { %v1533_v63 = vpack.c.bf16 %v949_v60, %v949_v60  ;;  %v1565_v0 = vpack.c.bf16 %v981_v61, %v981_v61  ;;  %v954_v1 = vsel %vm826_vm3, %v602_v44, %v890_v55  ;;  %v922_v3 = vmul.f32 0.2, %v730_v56  ;;  %v1647_v5 = vpop.f32.mrb[12].mxu0 }
  0xfe   : > { %1304 = vst.msk [vmem:[%s1879_s29 + $0x9c] sm:$0xf] %vm1264_vm1, %v1567_v59  ;;  %v1538_v2 = vpack.c.bf16 %v954_v1, %v954_v1  ;;  %vm824_vm5 = vcmp.gt.f32.partialorder %v594_v62, 0.0  ;;  %v888_v4 = vmul.f32 0.2, %v594_v62  ;;  %v605_v7 = vadd.f32 %v1644_v50, %v1868_v35  ;;  %v1679_v10 = vpop.f32.mrb[12].mxu1 }
  0xff   : > { %1270 = vst.msk [vmem:[%s1879_s29 + $0x14] sm:$0xf] %vm1264_vm1, %v1533_v63  ;;  %1302 = vst.msk [vmem:[%s1879_s29 + $0x94] sm:$0xf] %vm1264_vm1, %v1565_v0  ;;  %v733_v8 = vadd.f32 %v1676_v51, %v1868_v35  ;;  %v597_v9 = vadd.f32 %v1868_v35, %v596_v57  ;;  %v609_v11 = vpop.f32.mrb[13].mxu0  ;;  %v986_v12 = vsel %vm858_vm4, %v730_v56, %v922_v3  ;;  %v737_v16 = vpop.f32.mrb[13].mxu1 }
 0x100   : > { %1275 = vst.msk [vmem:[%s1879_s29 + $0x28] sm:$0xf] %vm1264_vm1, %v1538_v2  ;;  %v952_v13 = vsel %vm824_vm5, %v594_v62, %v888_v4  ;;  %v725_v14 = vadd.f32 %v1868_v35, %v724_v58  ;;  %v618_v15 = vadd.f32 %v1647_v5, %v1868_v35  ;;  %v1648_v17 = vpop.f32.mrb[14].mxu0  ;;  %v1570_v18 = vpack.c.bf16 %v986_v12, %v986_v12  ;;  %v1680_v21 = vpop.f32.mrb[14].mxu1 }
 0x101   : > { %v1536_v19 = vpack.c.bf16 %v952_v13, %v952_v13  ;;  %vm856_vm6 = vcmp.gt.f32.partialorder %v722_v6, 0.0  ;;  %v920_v20 = vmul.f32 0.2, %v722_v6  ;;  %v612_v22 = vpop.f32.mrb[15].mxu0  ;;  %vm827_vm7 = vcmp.gt.f32.partialorder %v605_v7, 0.0  ;;  %v740_v27 = vpop.f32.mrb[15].mxu1 }
 0x102   : > { %v891_v23 = vmul.f32 0.2, %v605_v7  ;;  %vm859_vm8 = vcmp.gt.f32.partialorder %v733_v8, 0.0  ;;  %v923_v24 = vmul.f32 0.2, %v733_v8  ;;  %vm825_vm9 = vcmp.gt.f32.partialorder %v597_v9, 0.0 }
 0x103   : > { %1307 = vst.msk [vmem:[%s1879_s29 + $0xa8] sm:$0xf] %vm1264_vm1, %v1570_v18  ;;  %1273 = vst.msk [vmem:[%s1879_s29 + $0x20] sm:$0xf] %vm1264_vm1, %v1536_v19  ;;  %v984_v25 = vsel %vm856_vm6, %v722_v6, %v920_v20  ;;  %v889_v26 = vmul.f32 0.2, %v597_v9  ;;  %v746_v39 = vadd.f32 %v1679_v10, %v1868_v35  ;;  %v610_v43 = vadd.f32 %v1868_v35, %v609_v11 }
 0x104   : > { %vm857_vm10 = vcmp.gt.f32.partialorder %v725_v14, 0.0  ;;  %v1568_v28 = vpack.c.bf16 %v984_v25, %v984_v25  ;;  %v955_v29 = vsel %vm827_vm7, %v605_v7, %v891_v23  ;;  %v987_v30 = vsel %vm859_vm8, %v733_v8, %v923_v24 }
 0x105   : > { %v921_v31 = vmul.f32 0.2, %v725_v14  ;;  %v1539_v32 = vpack.c.bf16 %v955_v29, %v955_v29  ;;  %v1571_v33 = vpack.c.bf16 %v987_v30, %v987_v30  ;;  %v953_v34 = vsel %vm825_vm9, %v597_v9, %v889_v26  ;;  %v1651_v40 = vpop.f32.mrb[16].mxu0 }
 0x106   : > { %vm830_vm11 = vcmp.gt.f32.partialorder %v618_v15, 0.0  ;;  %1305 = vst.msk [vmem:[%s1879_s29 + $0xa0] sm:$0xf] %vm1264_vm1, %v1568_v28  ;;  %v1537_v36 = vpack.c.bf16 %v953_v34, %v953_v34  ;;  %v894_v38 = vmul.f32 0.2, %v618_v15  ;;  %v1683_v41 = vpop.f32.mrb[16].mxu1  ;;  %v738_v44 = vadd.f32 %v1868_v35, %v737_v16 }
 0x107   : > { %v985_v37 = vsel %vm857_vm10, %v725_v14, %v921_v31  ;;  %1276 = vst.msk [vmem:[%s1879_s29 + $0x2c] sm:$0xf] %vm1264_vm1, %v1539_v32  ;;  %1308 = vst.msk [vmem:[%s1879_s29 + $0xac] sm:$0xf] %vm1264_vm1, %v1571_v33  ;;  %v621_v45 = vadd.f32 %v1648_v17, %v1868_v35  ;;  %v625_v46 = vpop.f32.mrb[17].mxu0  ;;  %v753_v47 = vpop.f32.mrb[17].mxu1  ;;  %v749_v50 = vadd.f32 %v1680_v21, %v1868_v35 }
 0x108   : > { %v1569_v42 = vpack.c.bf16 %v985_v37, %v985_v37  ;;  %1274 = vst.msk [vmem:[%s1879_s29 + $0x24] sm:$0xf] %vm1264_vm1, %v1537_v36  ;;  %v958_v48 = vsel %vm830_vm11, %v618_v15, %v894_v38  ;;  %vm862_vm12 = vcmp.gt.f32.partialorder %v746_v39, 0.0  ;;  %v926_v49 = vmul.f32 0.2, %v746_v39  ;;  %v1955_v51 = vpop.f32.mrb[18].mxu0 }
 0x109   : > { %v1957_v52 = vpop.f32.mrb[18].mxu1  ;;  %v1542_v53 = vpack.c.bf16 %v958_v48, %v958_v48  ;;  %vm828_vm13 = vcmp.gt.f32.partialorder %v610_v43, 0.0  ;;  %v892_v54 = vmul.f32 0.2, %v610_v43  ;;  %vm860_vm14 = vcmp.gt.f32.partialorder %v738_v44, 0.0  ;;  %v1961_v55 = vpop.f32.mrb[19].mxu0 }
 0x10a   : > { %1306 = vst.msk [vmem:[%s1879_s29 + $0xa4] sm:$0xf] %vm1264_vm1, %v1569_v42  ;;  %v1963_v56 = vpop.f32.mrb[19].mxu1  ;;  %v990_v57 = vsel %vm862_vm12, %v746_v39, %v926_v49  ;;  %v924_v58 = vmul.f32 0.2, %v738_v44  ;;  %vm831_vm15 = vcmp.gt.f32.partialorder %v621_v45, 0.0  ;;  %v613_v2 = vadd.f32 %v1868_v35, %v612_v22 }
 0x10b   : > { %v895_v59 = vmul.f32 0.2, %v621_v45  ;;  %1279 = vst.msk [vmem:[%s1879_s29 + $0x38] sm:$0xf] %vm1264_vm1, %v1542_v53  ;;  %v1574_v60 = vpack.c.bf16 %v990_v57, %v990_v57  ;;  %v956_v61 = vsel %vm828_vm13, %v610_v43, %v892_v54  ;;  %vm863_vm0 = vcmp.gt.f32.partialorder %v749_v50, 0.0 }
 0x10c   : > { %v927_v62 = vmul.f32 0.2, %v749_v50  ;;  %v1540_v63 = vpack.c.bf16 %v956_v61, %v956_v61  ;;  %v988_v0 = vsel %vm860_vm14, %v738_v44, %v924_v58  ;;  %v741_v6 = vadd.f32 %v1868_v35, %v740_v27 }
 0x10d   : > { %v959_v1 = vsel %vm831_vm15, %v621_v45, %v895_v59  ;;  %1311 = vst.msk [vmem:[%s1879_s29 + $0xb8] sm:$0xf] %vm1264_vm1, %v1574_v60  ;;  %v1572_v3 = vpack.c.bf16 %v988_v0, %v988_v0  ;;  %vm829_vm2 = vcmp.gt.f32.partialorder %v613_v2, 0.0  ;;  %v893_v8 = vmul.f32 0.2, %v613_v2  ;;  %v1655_v10 = vpop.f32.mrb[20].mxu0 }
 0x10e   : > { %v1543_v4 = vpack.c.bf16 %v959_v1, %v959_v1  ;;  %v991_v5 = vsel %vm863_vm0, %v749_v50, %v927_v62  ;;  %1277 = vst.msk [vmem:[%s1879_s29 + $0x30] sm:$0xf] %vm1264_vm1, %v1540_v63  ;;  %v634_v9 = vadd.f32 %v1651_v40, %v1868_v35  ;;  %v1687_v11 = vpop.f32.mrb[20].mxu1  ;;  %vm861_vm3 = vcmp.gt.f32.partialorder %v741_v6, 0.0  ;;  %v641_v15 = vpop.f32.mrb[21].mxu0 }
 0x10f   : > { %v1575_v7 = vpack.c.bf16 %v991_v5, %v991_v5  ;;  %1309 = vst.msk [vmem:[%s1879_s29 + $0xb0] sm:$0xf] %vm1264_vm1, %v1572_v3  ;;  %v925_v12 = vmul.f32 0.2, %v741_v6  ;;  %v762_v13 = vadd.f32 %v1683_v41, %v1868_v35  ;;  %v626_v14 = vadd.f32 %v1868_v35, %v625_v46  ;;  %v1980_v16 = vpop.f32.mrb[21].mxu1  ;;  %v1985_v20 = vpop.f32.mrb[22].mxu0 }
 0x110   : > { %1280 = vst.msk [vmem:[%s1879_s29 + $0x3c] sm:$0xf] %vm1264_vm1, %v1543_v4  ;;  %v957_v17 = vsel %vm829_vm2, %v613_v2, %v893_v8  ;;  %vm834_vm4 = vcmp.gt.f32.partialorder %v634_v9, 0.0  ;;  %v898_v18 = vmul.f32 0.2, %v634_v9  ;;  %v754_v19 = vadd.f32 %v1868_v35, %v753_v47  ;;  %v1987_v21 = vpop.f32.mrb[22].mxu1 }
 0x111   : > { %1312 = vst.msk [vmem:[%s1879_s29 + $0xbc] sm:$0xf] %vm1264_vm1, %v1575_v7  ;;  %v1541_v22 = vpack.c.bf16 %v957_v17, %v957_v17  ;;  %v989_v23 = vsel %vm861_vm3, %v741_v6, %v925_v12  ;;  %vm866_vm5 = vcmp.gt.f32.partialorder %v762_v13, 0.0  ;;  %v930_v24 = vmul.f32 0.2, %v762_v13  ;;  %v1989_v25 = vpop.f32.mrb[23].mxu0 }
 0x112   : > { %v1991_v26 = vpop.f32.mrb[23].mxu1  ;;  %v1573_v27 = vpack.c.bf16 %v989_v23, %v989_v23  ;;  %v962_v28 = vsel %vm834_vm4, %v634_v9, %v898_v18  ;;  %vm832_vm6 = vcmp.gt.f32.partialorder %v626_v14, 0.0  ;;  %v896_v29 = vmul.f32 0.2, %v626_v14 }
 0x113   : > { %1278 = vst.msk [vmem:[%s1879_s29 + $0x34] sm:$0xf] %vm1264_vm1, %v1541_v22  ;;  %v1546_v30 = vpack.c.bf16 %v962_v28, %v962_v28  ;;  %v994_v31 = vsel %vm866_vm5, %v762_v13, %v930_v24  ;;  %vm864_vm7 = vcmp.gt.f32.partialorder %v754_v19, 0.0  ;;  %v928_v32 = vmul.f32 0.2, %v754_v19 }
 0x114   : > { %1310 = vst.msk [vmem:[%s1879_s29 + $0xb4] sm:$0xf] %vm1264_vm1, %v1573_v27  ;;  %v1578_v33 = vpack.c.bf16 %v994_v31, %v994_v31  ;;  %v960_v34 = vsel %vm832_vm6, %v626_v14, %v896_v29  ;;  %v637_v36 = vadd.f32 %v1955_v51, %v1868_v35  ;;  %v765_v37 = vadd.f32 %v1957_v52, %v1868_v35 }
 0x115   : > { %1283 = vst.msk [vmem:[%s1879_s29 + $0x48] sm:$0xf] %vm1264_vm1, %v1546_v30  ;;  %v1544_v38 = vpack.c.bf16 %v960_v34, %v960_v34  ;;  %v992_v39 = vsel %vm864_vm7, %v754_v19, %v928_v32  ;;  %v629_v40 = vadd.f32 %v1868_v35, %v1961_v55  ;;  %v757_v41 = vadd.f32 %v1868_v35, %v1963_v56  ;;  %v2009_v44 = vpop.f32.mrb[24].mxu0 }
 0x116   : > { %1315 = vst.msk [vmem:[%s1879_s29 + $0xc8] sm:$0xf] %vm1264_vm1, %v1578_v33  ;;  %v1576_v42 = vpack.c.bf16 %v992_v39, %v992_v39  ;;  %vm835_vm8 = vcmp.gt.f32.partialorder %v637_v36, 0.0  ;;  %v899_v43 = vmul.f32 0.2, %v637_v36  ;;  %vm867_vm9 = vcmp.gt.f32.partialorder %v765_v37, 0.0 }
 0x117   : > { %v2011_v45 = vpop.f32.mrb[24].mxu1  ;;  %1281 = vst.msk [vmem:[%s1879_s29 + $0x40] sm:$0xf] %vm1264_vm1, %v1544_v38  ;;  %v931_v46 = vmul.f32 0.2, %v765_v37  ;;  %vm833_vm10 = vcmp.gt.f32.partialorder %v629_v40, 0.0  ;;  %v650_v50 = vadd.f32 %v1655_v10, %v1868_v35  ;;  %v778_v51 = vadd.f32 %v1687_v11, %v1868_v35 }
 0x118   : > { %v897_v47 = vmul.f32 0.2, %v629_v40  ;;  %vm865_vm11 = vcmp.gt.f32.partialorder %v757_v41, 0.0  ;;  %1313 = vst.msk [vmem:[%s1879_s29 + $0xc0] sm:$0xf] %vm1264_vm1, %v1576_v42  ;;  %v963_v48 = vsel %vm835_vm8, %v637_v36, %v899_v43  ;;  %v2019_v52 = vpop.f32.mrb[25].mxu0  ;;  %v642_v57 = vadd.f32 %v1868_v35, %v641_v15 }
 0x119   : > { %v929_v49 = vmul.f32 0.2, %v757_v41  ;;  %v2021_v53 = vpop.f32.mrb[25].mxu1  ;;  %v1547_v54 = vpack.c.bf16 %v963_v48, %v963_v48  ;;  %v995_v55 = vsel %vm867_vm9, %v765_v37, %v931_v46  ;;  %v2025_v58 = vpop.f32.mrb[26].mxu0  ;;  %vm838_vm12 = vcmp.gt.f32.partialorder %v650_v50, 0.0 }
 0x11a   : > { %v961_v56 = vsel %vm833_vm10, %v629_v40, %v897_v47  ;;  %v2027_v59 = vpop.f32.mrb[26].mxu1  ;;  %v1579_v60 = vpack.c.bf16 %v995_v55, %v995_v55  ;;  %v2030_v63 = vpop.f32.mrb[27].mxu0  ;;  %v902_v2 = vmul.f32 0.2, %v650_v50  ;;  %vm870_vm13 = vcmp.gt.f32.partialorder %v778_v51, 0.0 }
 0x11b   : > { %v1545_v61 = vpack.c.bf16 %v961_v56, %v961_v56  ;;  %v993_v62 = vsel %vm865_vm11, %v757_v41, %v929_v49  ;;  %v2032_v0 = vpop.f32.mrb[27].mxu1  ;;  %1284 = vst.msk [vmem:[%s1879_s29 + $0x4c] sm:$0xf] %vm1264_vm1, %v1547_v54  ;;  %v934_v3 = vmul.f32 0.2, %v778_v51  ;;  %vm836_vm14 = vcmp.gt.f32.partialorder %v642_v57, 0.0 }
 0x11c   : > { %v1577_v1 = vpack.c.bf16 %v993_v62, %v993_v62  ;;  %1316 = vst.msk [vmem:[%s1879_s29 + $0xcc] sm:$0xf] %vm1264_vm1, %v1579_v60  ;;  %v900_v4 = vmul.f32 0.2, %v642_v57  ;;  %v770_v5 = vadd.f32 %v1868_v35, %v1980_v16  ;;  %v653_v6 = vadd.f32 %v1985_v20, %v1868_v35 }
 0x11d   : > { %1282 = vst.msk [vmem:[%s1879_s29 + $0x44] sm:$0xf] %vm1264_vm1, %v1545_v61  ;;  %v966_v7 = vsel %vm838_vm12, %v650_v50, %v902_v2  ;;  %v998_v8 = vsel %vm870_vm13, %v778_v51, %v934_v3  ;;  %v781_v9 = vadd.f32 %v1987_v21, %v1868_v35  ;;  %v645_v10 = vadd.f32 %v1868_v35, %v1989_v25  ;;  %v2050_v14 = vpop.f32.mrb[28].mxu0 }
 0x11e   : > { %1314 = vst.msk [vmem:[%s1879_s29 + $0xc4] sm:$0xf] %vm1264_vm1, %v1577_v1  ;;  %v1550_v11 = vpack.c.bf16 %v966_v7, %v966_v7  ;;  %v1582_v12 = vpack.c.bf16 %v998_v8, %v998_v8  ;;  %v964_v13 = vsel %vm836_vm14, %v642_v57, %v900_v4  ;;  %vm868_vm15 = vcmp.gt.f32.partialorder %v770_v5, 0.0  ;;  %v2052_v15 = vpop.f32.mrb[28].mxu1  ;;  %v2054_v19 = vpop.f32.mrb[29].mxu0 }
 0x11f   : > { %v1548_v16 = vpack.c.bf16 %v964_v13, %v964_v13  ;;  %v932_v17 = vmul.f32 0.2, %v770_v5  ;;  %vm839_vm0 = vcmp.gt.f32.partialorder %v653_v6, 0.0  ;;  %v903_v18 = vmul.f32 0.2, %v653_v6  ;;  %v2066_v27 = vpop.f32.mrb[29].mxu1 }
 0x120   : > { %1287 = vst.msk [vmem:[%s1879_s29 + $0x58] sm:$0xf] %vm1264_vm1, %v1550_v11  ;;  %1319 = vst.msk [vmem:[%s1879_s29 + $0xd8] sm:$0xf] %vm1264_vm1, %v1582_v12  ;;  %vm871_vm2 = vcmp.gt.f32.partialorder %v781_v9, 0.0  ;;  %vm837_vm3 = vcmp.gt.f32.partialorder %v645_v10, 0.0  ;;  %v773_v24 = vadd.f32 %v1868_v35, %v1991_v26  ;;  %v666_v25 = vadd.f32 %v2009_v44, %v1868_v35 }
 0x121   : > { %v935_v20 = vmul.f32 0.2, %v781_v9  ;;  %v901_v21 = vmul.f32 0.2, %v645_v10  ;;  %1285 = vst.msk [vmem:[%s1879_s29 + $0x50] sm:$0xf] %vm1264_vm1, %v1548_v16  ;;  %v996_v22 = vsel %vm868_vm15, %v770_v5, %v932_v17  ;;  %v967_v23 = vsel %vm839_vm0, %v653_v6, %v903_v18 }
 0x122   : > { %v2068_v28 = vpop.f32.mrb[30].mxu0  ;;  %v1580_v29 = vpack.c.bf16 %v996_v22, %v996_v22  ;;  %v1551_v30 = vpack.c.bf16 %v967_v23, %v967_v23  ;;  %v2070_v33 = vpop.f32.mrb[30].mxu1  ;;  %vm869_vm4 = vcmp.gt.f32.partialorder %v773_v24, 0.0  ;;  %v933_v37 = vmul.f32 0.2, %v773_v24 }
 0x123   : > { %v999_v31 = vsel %vm871_vm2, %v781_v9, %v935_v20  ;;  %v965_v32 = vsel %vm837_vm3, %v645_v10, %v901_v21  ;;  %v2072_v34 = vpop.f32.mrb[31].mxu0  ;;  %v2074_v38 = vpop.f32.mrb[31].mxu1  ;;  %vm842_vm5 = vcmp.gt.f32.partialorder %v666_v25, 0.0  ;;  %v906_v39 = vmul.f32 0.2, %v666_v25 }
 0x124   : > { %v1583_v36 = vpack.c.bf16 %v999_v31, %v999_v31  ;;  %v1549_v26 = vpack.c.bf16 %v965_v32, %v965_v32  ;;  %1317 = vst.msk [vmem:[%s1879_s29 + $0xd0] sm:$0xf] %vm1264_vm1, %v1580_v29  ;;  %1288 = vst.msk [vmem:[%s1879_s29 + $0x5c] sm:$0xf] %vm1264_vm1, %v1551_v30  ;;  %v794_v40 = vadd.f32 %v2011_v45, %v1868_v35 }
 0x125   : > { %v658_v41 = vadd.f32 %v1868_v35, %v2019_v52  ;;  %v997_v42 = vsel %vm869_vm4, %v773_v24, %v933_v37  ;;  %v786_v43 = vadd.f32 %v1868_v35, %v2021_v53  ;;  %v669_v44 = vadd.f32 %v2025_v58, %v1868_v35 }
 0x126   : > { %1320 = vst.msk [vmem:[%s1879_s29 + $0xdc] sm:$0xf] %vm1264_vm1, %v1583_v36  ;;  %1286 = vst.msk [vmem:[%s1879_s29 + $0x54] sm:$0xf] %vm1264_vm1, %v1549_v26  ;;  %v797_v46 = vadd.f32 %v2027_v59, %v1868_v35  ;;  %v1581_v45 = vpack.c.bf16 %v997_v42, %v997_v42  ;;  %v970_v47 = vsel %vm842_vm5, %v666_v25, %v906_v39  ;;  %vm874_vm6 = vcmp.gt.f32.partialorder %v794_v40, 0.0 }
 0x127   : > { %v938_v48 = vmul.f32 0.2, %v794_v40  ;;  %v1554_v49 = vpack.c.bf16 %v970_v47, %v970_v47  ;;  %vm840_vm7 = vcmp.gt.f32.partialorder %v658_v41, 0.0  ;;  %v904_v50 = vmul.f32 0.2, %v658_v41 }
 0x128   : > { %vm872_vm8 = vcmp.gt.f32.partialorder %v786_v43, 0.0  ;;  %1318 = vst.msk [vmem:[%s1879_s29 + $0xd4] sm:$0xf] %vm1264_vm1, %v1581_v45  ;;  %v936_v52 = vmul.f32 0.2, %v786_v43  ;;  %vm843_vm9 = vcmp.gt.f32.partialorder %v669_v44, 0.0  ;;  %v661_v60 = vadd.f32 %v1868_v35, %v2030_v63 }
 0x129   : > { %v1002_v51 = vsel %vm874_vm6, %v794_v40, %v938_v48  ;;  %v907_v53 = vmul.f32 0.2, %v669_v44  ;;  %1291 = vst.msk [vmem:[%s1879_s29 + $0x68] sm:$0xf] %vm1264_vm1, %v1554_v49  ;;  %v968_v55 = vsel %vm840_vm7, %v658_v41, %v904_v50  ;;  %vm875_vm10 = vcmp.gt.f32.partialorder %v797_v46, 0.0 }
 0x12a   : > { %v1586_v54 = vpack.c.bf16 %v1002_v51, %v1002_v51  ;;  %v939_v56 = vmul.f32 0.2, %v797_v46  ;;  %v1552_v57 = vpack.c.bf16 %v968_v55, %v968_v55  ;;  %v1000_v58 = vsel %vm872_vm8, %v786_v43, %v936_v52 }
 0x12b   : > { %v971_v59 = vsel %vm843_vm9, %v669_v44, %v907_v53  ;;  %v1584_v61 = vpack.c.bf16 %v1000_v58, %v1000_v58  ;;  %v789_v2 = vadd.f32 %v1868_v35, %v2032_v0  ;;  %vm841_vm11 = vcmp.gt.f32.partialorder %v661_v60, 0.0 }
 0x12c   : > { %1323 = vst.msk [vmem:[%s1879_s29 + $0xe8] sm:$0xf] %vm1264_vm1, %v1586_v54  ;;  %v1555_v62 = vpack.c.bf16 %v971_v59, %v971_v59  ;;  %v1003_v1 = vsel %vm875_vm10, %v797_v46, %v939_v56  ;;  %1289 = vst.msk [vmem:[%s1879_s29 + $0x60] sm:$0xf] %vm1264_vm1, %v1552_v57  ;;  %v905_v4 = vmul.f32 0.2, %v661_v60  ;;  %v682_v5 = vadd.f32 %v2050_v14, %v1868_v35 }
 0x12d   : > { %v1587_v3 = vpack.c.bf16 %v1003_v1, %v1003_v1  ;;  %1321 = vst.msk [vmem:[%s1879_s29 + $0xe0] sm:$0xf] %vm1264_vm1, %v1584_v61  ;;  %vm873_vm12 = vcmp.gt.f32.partialorder %v789_v2, 0.0  ;;  %v937_v63 = vmul.f32 0.2, %v789_v2  ;;  %v810_v6 = vadd.f32 %v2052_v15, %v1868_v35 }
 0x12e   : > { %1292 = vst.msk [vmem:[%s1879_s29 + $0x6c] sm:$0xf] %vm1264_vm1, %v1555_v62  ;;  %v674_v0 = vadd.f32 %v1868_v35, %v2054_v19  ;;  %v969_v7 = vsel %vm841_vm11, %v661_v60, %v905_v4  ;;  %vm846_vm13 = vcmp.gt.f32.partialorder %v682_v5, 0.0  ;;  %v910_v8 = vmul.f32 0.2, %v682_v5 }
 0x12f   : > { %1324 = vst.msk [vmem:[%s1879_s29 + $0xec] sm:$0xf] %vm1264_vm1, %v1587_v3  ;;  %v802_v9 = vadd.f32 %v1868_v35, %v2066_v27  ;;  %v1553_v10 = vpack.c.bf16 %v969_v7, %v969_v7  ;;  %v1001_v11 = vsel %vm873_vm12, %v789_v2, %v937_v63  ;;  %vm878_vm14 = vcmp.gt.f32.partialorder %v810_v6, 0.0 }
 0x130   : > { %v942_v12 = vmul.f32 0.2, %v810_v6  ;;  %v1585_v13 = vpack.c.bf16 %v1001_v11, %v1001_v11  ;;  %v974_v14 = vsel %vm846_vm13, %v682_v5, %v910_v8  ;;  %vm844_vm15 = vcmp.gt.f32.partialorder %v674_v0, 0.0 }
 0x131   : > { %v908_v15 = vmul.f32 0.2, %v674_v0  ;;  %1290 = vst.msk [vmem:[%s1879_s29 + $0x64] sm:$0xf] %vm1264_vm1, %v1553_v10  ;;  %v1558_v16 = vpack.c.bf16 %v974_v14, %v974_v14  ;;  %vm876_vm0 = vcmp.gt.f32.partialorder %v802_v9, 0.0  ;;  %v685_v21 = vadd.f32 %v2068_v28, %v1868_v35 }
 0x132   : > { %v1006_v17 = vsel %vm878_vm14, %v810_v6, %v942_v12  ;;  %v940_v18 = vmul.f32 0.2, %v802_v9  ;;  %1322 = vst.msk [vmem:[%s1879_s29 + $0xe4] sm:$0xf] %vm1264_vm1, %v1585_v13  ;;  %v813_v22 = vadd.f32 %v2070_v33, %v1868_v35  ;;  %v677_v25 = vadd.f32 %v1868_v35, %v2072_v34 }
 0x133   : > { %v1590_v19 = vpack.c.bf16 %v1006_v17, %v1006_v17  ;;  %v972_v20 = vsel %vm844_vm15, %v674_v0, %v908_v15  ;;  %1295 = vst.msk [vmem:[%s1879_s29 + $0x78] sm:$0xf] %vm1264_vm1, %v1558_v16  ;;  %v805_v27 = vadd.f32 %v1868_v35, %v2074_v38  ;;  %vm847_vm2 = vcmp.gt.f32.partialorder %v685_v21, 0.0 }
 0x134   : > { %v1556_v23 = vpack.c.bf16 %v972_v20, %v972_v20  ;;  %v1004_v24 = vsel %vm876_vm0, %v802_v9, %v940_v18  ;;  %v911_v30 = vmul.f32 0.2, %v685_v21  ;;  %vm879_vm3 = vcmp.gt.f32.partialorder %v813_v22, 0.0 }
 0x135   : > { %1327 = vst.msk [vmem:[%s1879_s29 + $0xf8] sm:$0xf] %vm1264_vm1, %v1590_v19  ;;  %v1588_v29 = vpack.c.bf16 %v1004_v24, %v1004_v24  ;;  %v943_v28 = vmul.f32 0.2, %v813_v22  ;;  %vm845_vm4 = vcmp.gt.f32.partialorder %v677_v25, 0.0  ;;  %vm877_vm5 = vcmp.gt.f32.partialorder %v805_v27, 0.0 }
 0x136   : > { %1293 = vst.msk [vmem:[%s1879_s29 + $0x70] sm:$0xf] %vm1264_vm1, %v1556_v23  ;;  %v909_v31 = vmul.f32 0.2, %v677_v25  ;;  %v975_v32 = vsel %vm847_vm2, %v685_v21, %v911_v30  ;;  %v941_v35 = vmul.f32 0.2, %v805_v27 }
 0x137   : > { %1325 = vst.msk [vmem:[%s1879_s29 + $0xf0] sm:$0xf] %vm1264_vm1, %v1588_v29  ;;  %v1559_v33 = vpack.c.bf16 %v975_v32, %v975_v32  ;;  %v1007_v34 = vsel %vm879_vm3, %v813_v22, %v943_v28 }
 0x138   : > { %v973_v36 = vsel %vm845_vm4, %v677_v25, %v909_v31  ;;  %v1591_v26 = vpack.c.bf16 %v1007_v34, %v1007_v34  ;;  %v1005_v38 = vsel %vm877_vm5, %v805_v27, %v941_v35 }
 0x139   : > { %v1557_v37 = vpack.c.bf16 %v973_v36, %v973_v36  ;;  %1296 = vst.msk [vmem:[%s1879_s29 + $0x7c] sm:$0xf] %vm1264_vm1, %v1559_v33  ;;  %v1589_v39 = vpack.c.bf16 %v1005_v38, %v1005_v38 }
 0x13a   : > { %1328 = vst.msk [vmem:[%s1879_s29 + $0xfc] sm:$0xf] %vm1264_vm1, %v1591_v26 }
 0x13b   : > { %1294 = vst.msk [vmem:[%s1879_s29 + $0x74] sm:$0xf] %vm1264_vm1, %v1557_v37  ;;  %1326 = vst.msk [vmem:[%s1879_s29 + $0xf4] sm:$0xf] %vm1264_vm1, %v1589_v39 }
 0x13c PF: > { %s13_s12 = sadd.s32 1, %s1752_s12  }
 0x13d   : > { %p10_p4 = scmp.ge.s32.totalorder %s13_s12, 6  }
 0x13f   :  { %12 = sbr.rel (!%p10_p4) target bundleno = 1 (0x1), region = 62 }

// kernel: discriminator_forward.6
= control target key start
LH: loop header
LB: loop body
LE: loop exit
PB: predicated region body
PF: predicated region fallthrough
CT: control target
= control target key end

     0   :  { %s1239_s15 = smov 0   ;;  %s1576_s0 = inlined_call_operand.vmem [shape: bf16[512,64], index: 0, kind: input, shape index: {}]   ;;  %s1577_s1 = inlined_call_operand.vmem [shape: bf16[64,8], index: 1, kind: input, shape index: {}]   ;;  %s1578_s2 = inlined_call_operand.vmem [shape: f32[1,8], index: 2, kind: input, shape index: {}]   ;;  %s1579_s3 = inlined_call_operand.vmem [shape: bf16[512,8], index: 3, kind: output, shape index: {0}]   ;;  %s1580_s4 = inlined_call_operand.vmem [shape: f32[2,2,8], index: 4, kind: output, shape index: {1}]  }
   0x1 LB: > { %s1245_s16 = sadd.s32 4294967295, %s1212_s15   ;;  %p1001_p0 = scmp.ge.s32.totalorder %s1212_s15, 1  ;;  %s1212_s15 = sphi %s1239_s15, %s15_s15  }
   0x2   : > { %p166_p1 = scmp.lt.s32.totalorder %s1212_s15, 3 }
   0x4   : > { %p167_p2 = pnand %p1001_p0, %p166_p1 }
   0x5   : > { %v1186_v0 = vld [vmem:[%s1577_s1] sm:$0xff] (!%p167_p2)   ;;  %s1002_s19 = sshll.u32 (!%p167_p2), %s1245_s16, 5  ;;  %v1187_v1 = vld [vmem:[%s1577_s1 + $0x8] sm:$0xff] (!%p167_p2)   ;;  %v1188_v2 = vld [vmem:[%s1577_s1 + $0x10] sm:$0xff] (!%p167_p2)   ;;  %vm364_vm0 = vcmask (!%p167_p2), 523264   ;;  %vm702_vm1 = vcmask (!%p167_p2), 60416  }
   0x6   : > { %170 = sbr.rel (%p167_p2) target bundleno = 318 (0x13e), region = 32  ;;  %p197_p3 = scmp.lt.s32.totalorder (!%p167_p2), %s1002_s19, 63  ;;  %1130 = vmatprep.subr.bf16.mxu0 (!%p167_p2), %v1186_v0  ;;  %1170 = vmatprep.subr.bf16.mxu1 (!%p167_p2), %v1186_v0  ;;  %v1189_v4 = vld [vmem:[%s1577_s1 + $0x18] sm:$0xff] (!%p167_p2)   ;;  %v1307_v20 = vld [vmem:[%s1578_s2] ss:$0 sm:$0xff] (!%p167_p2)  ;;  %vm735_vm2 = vcmask (!%p167_p2), 64512  }
   0x7   : > { %1131 = vmatpush3.bf16.msra.mxu0 (!%p167_p2), %v1186_v0  ;;  %1174 = vmatpush3.bf16.msra.mxu1 (!%p167_p2), %v1186_v0  ;;  %p208_p4 = scmp.lt.s32.totalorder (!%p167_p2), %s1245_s16, 1  ;;  %vm906_vm3 = vcmask (!%p167_p2), 1040384   ;;  %vm908_vm4 = vcmask (!%p167_p2), 58368  }
   0x8   : > { %1132 = vmatprep.subr.bf16.mxu0 (!%p167_p2), %v1187_v1  ;;  %1171 = vmatprep.subr.bf16.mxu1 (!%p167_p2), %v1187_v1 }
   0xb   : > { %1133 = vmatpush3.bf16.msra.mxu0 (!%p167_p2), %v1187_v1  ;;  %1175 = vmatpush3.bf16.msra.mxu1 (!%p167_p2), %v1187_v1 }
   0xc   : > { %1134 = vmatprep.subr.bf16.mxu0 (!%p167_p2), %v1188_v2  ;;  %1172 = vmatprep.subr.bf16.mxu1 (!%p167_p2), %v1188_v2 }
   0xd   : > { %s1582_s19 = smov (!%p197_p3, %s1002_s19), 63  ;;  %s1584_s16 = smov (!%p208_p4, %s1245_s16), 1 }
   0xe   : > { %s1003_s24 = sshll.u32 %s1582_s19, 2  ;;  %s1006_s9 = sshll.u32 %s1584_s16, 1 }
   0xf   : > { %s1267_s27 = scalar_lea.vmem %s1576_s0, %s1003_s24  ;;  %1135 = vmatpush3.bf16.msra.mxu0 %v1188_v2  ;;  %1176 = vmatpush3.bf16.msra.mxu1 %v1188_v2  ;;  %s1315_s8 = scalar_lea.vmem %s1579_s3, %s1003_s24 }
  0x10   : > { %v1190_v3 = vld [vmem:[%s1267_s27] sm:$0xff]   ;;  %1136 = vmatprep.subr.bf16.mxu0 %v1189_v4  ;;  %1173 = vmatprep.subr.bf16.mxu1 %v1189_v4  ;;  %v1191_v5 = vld [vmem:[%s1267_s27 + $0x8] sm:$0xff]   ;;  %v1192_v6 = vld [vmem:[%s1267_s27 + $0x10] sm:$0xff]   ;;  %s211_s12 = scalar_lea.vmem %s1580_s4, %s1006_s9 }
  0x11   : > { %1138 = vmatprep.mubr.msk.bf16.mxu0 %vm364_vm0, %v1190_v3  ;;  %v1198_v7 = vld [vmem:[%s1267_s27 + $0x40] sm:$0xff]   ;;  %v1199_v8 = vld [vmem:[%s1267_s27 + $0x48] sm:$0xff]   ;;  %v1200_v9 = vld [vmem:[%s1267_s27 + $0x50] sm:$0xff]  }
  0x12   : > { %1154 = vmatprep.mubr.msk.bf16.mxu1 %vm364_vm0, %v1198_v7  ;;  %v1193_v10 = vld [vmem:[%s1267_s27 + $0x18] sm:$0xff]   ;;  %v1194_v12 = vld [vmem:[%s1267_s27 + $0x20] sm:$0xff]   ;;  %v1195_v14 = vld [vmem:[%s1267_s27 + $0x28] sm:$0xff]  }
  0x13   : > { %1137 = vmatpush3.bf16.msra.mxu0 %v1189_v4  ;;  %1177 = vmatpush3.bf16.msra.mxu1 %v1189_v4  ;;  %v1201_v11 = vld [vmem:[%s1267_s27 + $0x58] sm:$0xff]   ;;  %v1202_v13 = vld [vmem:[%s1267_s27 + $0x60] sm:$0xff]   ;;  %v1203_v15 = vld [vmem:[%s1267_s27 + $0x68] sm:$0xff]  }
  0x14   : > { %v1196_v16 = vld [vmem:[%s1267_s27 + $0x30] sm:$0xff]   ;;  %v1197_v18 = vld [vmem:[%s1267_s27 + $0x38] sm:$0xff]  }
  0x15   : > { %v1204_v17 = vld [vmem:[%s1267_s27 + $0x70] sm:$0xff]   ;;  %v1205_v19 = vld [vmem:[%s1267_s27 + $0x78] sm:$0xff]  }
  0x16   : > { %1139 = vmatmul.mubr.msk.bf16.vlgmr.msra.gmra.mrb[0].mxu0 %vm364_vm0, %v1191_v5  ;;  %1155 = vmatmul.mubr.msk.bf16.vlgmr.msra.gmra.mrb[0].mxu1 %vm364_vm0, %v1199_v8 }
  0x17   : > { %1142 = vmatprep.mubr.msk.bf16.mxu0 %vm364_vm0, %v1192_v6  ;;  %1158 = vmatprep.mubr.msk.bf16.mxu1 %vm364_vm0, %v1200_v9 }
  0x1e   : > { %1143 = vmatmul.mubr.msk.bf16.gmra.mrb[4].mxu0 %vm364_vm0, %v1193_v10  ;;  %1159 = vmatmul.mubr.msk.bf16.gmra.mrb[4].mxu1 %vm364_vm0, %v1201_v11 }
  0x1f   : > { %1146 = vmatprep.mubr.msk.bf16.mxu0 %vm364_vm0, %v1194_v12  ;;  %1162 = vmatprep.mubr.msk.bf16.mxu1 %vm364_vm0, %v1202_v13 }
  0x26   : > { %1147 = vmatmul.mubr.msk.bf16.gmra.mrb[8].mxu0 %vm364_vm0, %v1195_v14  ;;  %1163 = vmatmul.mubr.msk.bf16.gmra.mrb[8].mxu1 %vm364_vm0, %v1203_v15 }
  0x27   : > { %1150 = vmatprep.mubr.msk.bf16.mxu0 %vm364_vm0, %v1196_v16  ;;  %1166 = vmatprep.mubr.msk.bf16.mxu1 %vm364_vm0, %v1204_v17 }
  0x2e   : > { %1151 = vmatmul.mubr.msk.bf16.gmra.mrb[12].mxu0 %vm364_vm0, %v1197_v18  ;;  %1167 = vmatmul.mubr.msk.bf16.gmra.mrb[12].mxu1 %vm364_vm0, %v1205_v19 }
  0xe9   : > { %v1140_v21 = vpop.f32.mrb[0].mxu0  ;;  %v1156_v22 = vpop.f32.mrb[0].mxu1 }
  0xea   : > { %v456_v23 = vadd.f32 %v1140_v21, %v1307_v20  ;;  %v447_v24 = vpop.f32.mrb[1].mxu0  ;;  %v511_v25 = vpop.f32.mrb[1].mxu1  ;;  %v1320_v32 = vadd.f32 %v1156_v22, %v1307_v20 }
  0xeb   : > { %v448_v26 = vadd.f32 %v1307_v20, %v447_v24  ;;  %v1141_v27 = vpop.f32.mrb[2].mxu0  ;;  %v1157_v28 = vpop.f32.mrb[2].mxu1  ;;  %v1324_v37 = vadd.f32 %v1307_v20, %v511_v25 }
  0xec   : > { %v1080_v29 = vpack.c.bf16 %v456_v23, %v456_v23  ;;  %v459_v30 = vadd.f32 %v1141_v27, %v1307_v20  ;;  %v450_v31 = vpop.f32.mrb[3].mxu0  ;;  %v514_v33 = vpop.f32.mrb[3].mxu1  ;;  %v807_v38 = vmul.f32 %v456_v23, %v456_v23  ;;  %v1096_v46 = vpack.c.bf16 %v1320_v32, %v1320_v32 }
  0xed   : > { %v1078_v34 = vpack.c.bf16 %v448_v26, %v448_v26  ;;  %v805_v35 = vmul.f32 %v448_v26, %v448_v26  ;;  %v451_v36 = vadd.f32 %v1307_v20, %v450_v31  ;;  %v736_v40 = vsel %vm735_vm2, %v448_v26, 0.0 }
  0xee   : > { %705 = vst.msk [vmem:[%s1315_s8 + $0x8] sm:$0xf] %vm702_vm1, %v1080_v29  ;;  %v1081_v39 = vpack.c.bf16 %v459_v30, %v459_v30  ;;  %v808_v44 = vmul.f32 %v459_v30, %v459_v30  ;;  %v739_v47 = vsel %vm735_vm2, %v456_v23, 0.0  ;;  %v1094_v51 = vpack.c.bf16 %v1324_v37, %v1324_v37  ;;  %721 = vst.msk [vmem:[%s1315_s8 + $0x48] sm:$0xf] %vm702_vm1, %v1096_v46 }
  0xef   : > { %703 = vst.msk [vmem:[%s1315_s8] sm:$0xf] %vm702_vm1, %v1078_v34  ;;  %v1079_v41 = vpack.c.bf16 %v451_v36, %v451_v36  ;;  %v737_v42 = vsel %vm735_vm2, %v451_v36, 0.0  ;;  %v806_v43 = vmul.f32 %v451_v36, %v451_v36  ;;  %v837_v48 = vsel %vm735_vm2, %v805_v35, 0.0 }
  0xf0   : > { %706 = vst.msk [vmem:[%s1315_s8 + $0xc] sm:$0xf] %vm702_vm1, %v1081_v39  ;;  %v738_v45 = vadd.f32 %v737_v42, %v736_v40  ;;  %v840_v58 = vsel %vm735_vm2, %v807_v38, 0.0  ;;  %719 = vst.msk [vmem:[%s1315_s8 + $0x40] sm:$0xf] %vm702_vm1, %v1094_v51  ;;  %v1355_v61 = vadd.f32 %v1157_v28, %v1307_v20  ;;  %v741_v63 = vsel %vm735_vm2, %v459_v30, 0.0 }
  0xf1   : > { %704 = vst.msk [vmem:[%s1315_s8 + $0x4] sm:$0xf] %vm702_vm1, %v1079_v41  ;;  %v838_v49 = vsel %vm735_vm2, %v806_v43, 0.0  ;;  %v1144_v50 = vpop.f32.mrb[4].mxu0  ;;  %v1343_v52 = vpop.f32.mrb[4].mxu1  ;;  %v842_v0 = vsel %vm735_vm2, %v808_v44, 0.0  ;;  %v1374_v15 = vadd.f32 %v1307_v20, %v514_v33 }
  0xf2   : > { %v740_v53 = vadd.f32 %v739_v47, %v738_v45  ;;  %v839_v54 = vadd.f32 %v838_v49, %v837_v48  ;;  %v472_v55 = vadd.f32 %v1144_v50, %v1307_v20  ;;  %v463_v56 = vpop.f32.mrb[5].mxu0  ;;  %v1348_v57 = vpop.f32.mrb[5].mxu1  ;;  %v1097_v14 = vpack.c.bf16 %v1355_v61, %v1355_v61 }
  0xf3   : > { %v464_v59 = vadd.f32 %v1307_v20, %v463_v56  ;;  %v1145_v60 = vpop.f32.mrb[6].mxu0  ;;  %v1357_v62 = vpop.f32.mrb[6].mxu1  ;;  %v1095_v35 = vpack.c.bf16 %v1374_v15, %v1374_v15 }
  0xf4   : > { %v841_v1 = vadd.f32 %v840_v58, %v839_v54  ;;  %v1084_v2 = vpack.c.bf16 %v472_v55, %v472_v55  ;;  %v466_v3 = vpop.f32.mrb[7].mxu0  ;;  %v1361_v4 = vpop.f32.mrb[7].mxu1  ;;  %v742_v6 = vadd.f32 %v741_v63, %v740_v53  ;;  %v475_v10 = vadd.f32 %v1145_v60, %v1307_v20  ;;  %722 = vst.msk [vmem:[%s1315_s8 + $0x4c] sm:$0xf] %vm702_vm1, %v1097_v14 }
  0xf5   : > { %v1082_v5 = vpack.c.bf16 %v464_v59, %v464_v59  ;;  %v743_v7 = vsel %vm735_vm2, %v464_v59, 0.0  ;;  %v809_v8 = vmul.f32 %v464_v59, %v464_v59  ;;  %v467_v11 = vadd.f32 %v1307_v20, %v466_v3  ;;  %720 = vst.msk [vmem:[%s1315_s8 + $0x44] sm:$0xf] %vm702_vm1, %v1095_v35 }
  0xf6   : > { %709 = vst.msk [vmem:[%s1315_s8 + $0x18] sm:$0xf] %vm702_vm1, %v1084_v2  ;;  %v843_v9 = vadd.f32 %v842_v0, %v841_v1  ;;  %v744_v12 = vadd.f32 %v743_v7, %v742_v6  ;;  %v811_v16 = vmul.f32 %v472_v55, %v472_v55  ;;  %v1085_v18 = vpack.c.bf16 %v475_v10, %v475_v10 }
  0xf7   : > { %707 = vst.msk [vmem:[%s1315_s8 + $0x10] sm:$0xf] %vm702_vm1, %v1082_v5  ;;  %v844_v13 = vsel %vm735_vm2, %v809_v8, 0.0  ;;  %v1083_v19 = vpack.c.bf16 %v467_v11, %v467_v11  ;;  %v745_v21 = vsel %vm735_vm2, %v467_v11, 0.0  ;;  %v810_v22 = vmul.f32 %v467_v11, %v467_v11 }
  0xf8   : > { %v845_v17 = vadd.f32 %v844_v13, %v843_v9  ;;  %v747_v25 = vsel %vm735_vm2, %v472_v55, 0.0  ;;  %710 = vst.msk [vmem:[%s1315_s8 + $0x1c] sm:$0xf] %vm702_vm1, %v1085_v18  ;;  %v746_v26 = vadd.f32 %v745_v21, %v744_v12  ;;  %v812_v30 = vmul.f32 %v475_v10, %v475_v10 }
  0xf9   : > { %v1148_v23 = vpop.f32.mrb[8].mxu0  ;;  %v1379_v24 = vpop.f32.mrb[8].mxu1  ;;  %708 = vst.msk [vmem:[%s1315_s8 + $0x14] sm:$0xf] %vm702_vm1, %v1083_v19  ;;  %v846_v31 = vsel %vm735_vm2, %v810_v22, 0.0  ;;  %v848_v38 = vsel %vm735_vm2, %v811_v16, 0.0  ;;  %v1425_v14 = vadd.f32 %v1343_v52, %v1307_v20 }
  0xfa   : > { %v488_v27 = vadd.f32 %v1148_v23, %v1307_v20  ;;  %v479_v28 = vpop.f32.mrb[9].mxu0  ;;  %v1385_v29 = vpop.f32.mrb[9].mxu1  ;;  %v748_v39 = vadd.f32 %v747_v25, %v746_v26  ;;  %v847_v40 = vadd.f32 %v846_v31, %v845_v17  ;;  %v749_v44 = vsel %vm735_vm2, %v475_v10, 0.0 }
  0xfb   : > { %v480_v33 = vadd.f32 %v1307_v20, %v479_v28  ;;  %v1149_v34 = vpop.f32.mrb[10].mxu0  ;;  %v1393_v36 = vpop.f32.mrb[10].mxu1  ;;  %v850_v53 = vsel %vm735_vm2, %v812_v30, 0.0 }
  0xfc   : > { %v1088_v41 = vpack.c.bf16 %v488_v27, %v488_v27  ;;  %v482_v42 = vpop.f32.mrb[11].mxu0  ;;  %v1396_v43 = vpop.f32.mrb[11].mxu1  ;;  %v849_v48 = vadd.f32 %v848_v38, %v847_v40  ;;  %v750_v49 = vadd.f32 %v749_v44, %v748_v39  ;;  %v491_v50 = vadd.f32 %v1149_v34, %v1307_v20 }
  0xfd   : > { %v1086_v45 = vpack.c.bf16 %v480_v33, %v480_v33  ;;  %v751_v46 = vsel %vm735_vm2, %v480_v33, 0.0  ;;  %v813_v47 = vmul.f32 %v480_v33, %v480_v33  ;;  %v483_v51 = vadd.f32 %v1307_v20, %v482_v42 }
  0xfe   : > { %713 = vst.msk [vmem:[%s1315_s8 + $0x28] sm:$0xf] %vm702_vm1, %v1088_v41  ;;  %v815_v55 = vmul.f32 %v488_v27, %v488_v27  ;;  %v752_v56 = vadd.f32 %v751_v46, %v750_v49  ;;  %v851_v58 = vadd.f32 %v850_v53, %v849_v48  ;;  %v1089_v59 = vpack.c.bf16 %v491_v50, %v491_v50 }
  0xff   : > { %711 = vst.msk [vmem:[%s1315_s8 + $0x20] sm:$0xf] %vm702_vm1, %v1086_v45  ;;  %v852_v54 = vsel %vm735_vm2, %v813_v47, 0.0  ;;  %v1087_v60 = vpack.c.bf16 %v483_v51, %v483_v51  ;;  %v753_v63 = vsel %vm735_vm2, %v483_v51, 0.0  ;;  %v814_v0 = vmul.f32 %v483_v51, %v483_v51 }
 0x100   : > { %v755_v3 = vsel %vm735_vm2, %v488_v27, 0.0  ;;  %v853_v5 = vadd.f32 %v852_v54, %v851_v58  ;;  %714 = vst.msk [vmem:[%s1315_s8 + $0x2c] sm:$0xf] %vm702_vm1, %v1089_v59  ;;  %v754_v6 = vadd.f32 %v753_v63, %v752_v56  ;;  %v816_v10 = vmul.f32 %v491_v50, %v491_v50 }
 0x101   : > { %v1152_v1 = vpop.f32.mrb[12].mxu0  ;;  %v1411_v2 = vpop.f32.mrb[12].mxu1  ;;  %712 = vst.msk [vmem:[%s1315_s8 + $0x24] sm:$0xf] %vm702_vm1, %v1087_v60  ;;  %v854_v11 = vsel %vm735_vm2, %v814_v0, 0.0  ;;  %v856_v17 = vsel %vm735_vm2, %v815_v55, 0.0  ;;  %v1100_v38 = vpack.c.bf16 %v1425_v14, %v1425_v14  ;;  %v821_v42 = vmul.f32 %v1324_v37, %v1324_v37 }
 0x102   : > { %v504_v7 = vadd.f32 %v1152_v1, %v1307_v20  ;;  %v495_v8 = vpop.f32.mrb[13].mxu0  ;;  %v1417_v9 = vpop.f32.mrb[13].mxu1  ;;  %v756_v18 = vadd.f32 %v755_v3, %v754_v6  ;;  %v855_v19 = vadd.f32 %v854_v11, %v853_v5  ;;  %v757_v25 = vsel %vm735_vm2, %v491_v50, 0.0 }
 0x103   : > { %v496_v12 = vadd.f32 %v1307_v20, %v495_v8  ;;  %v1153_v13 = vpop.f32.mrb[14].mxu0  ;;  %v1427_v16 = vpop.f32.mrb[14].mxu1  ;;  %v858_v34 = vsel %vm735_vm2, %v816_v10, 0.0  ;;  %725 = vst.msk [vmem:[%s1315_s8 + $0x58] sm:$0xf] %vm702_vm1, %v1100_v38  ;;  %v528_v51 = vadd.f32 %v1307_v20, %v1348_v57  ;;  %v1459_v55 = vadd.f32 %v1357_v62, %v1307_v20 }
 0x104   : > { %v1092_v21 = vpack.c.bf16 %v504_v7, %v504_v7  ;;  %v498_v22 = vpop.f32.mrb[15].mxu0  ;;  %v1430_v23 = vpop.f32.mrb[15].mxu1  ;;  %v857_v30 = vadd.f32 %v856_v17, %v855_v19  ;;  %v758_v52 = vadd.f32 %v757_v25, %v756_v18  ;;  %v507_v31 = vadd.f32 %v1153_v13, %v1307_v20 }
 0x105   : > { %v1090_v26 = vpack.c.bf16 %v496_v12, %v496_v12  ;;  %v759_v27 = vsel %vm735_vm2, %v496_v12, 0.0  ;;  %v817_v28 = vmul.f32 %v496_v12, %v496_v12  ;;  %v499_v33 = vadd.f32 %v1307_v20, %v498_v22 }
 0x106   : > { %717 = vst.msk [vmem:[%s1315_s8 + $0x38] sm:$0xf] %vm702_vm1, %v1092_v21  ;;  %v760_v39 = vadd.f32 %v759_v27, %v758_v52  ;;  %v859_v40 = vadd.f32 %v858_v34, %v857_v30  ;;  %v1093_v41 = vpack.c.bf16 %v507_v31, %v507_v31  ;;  %v819_v44 = vmul.f32 %v504_v7, %v504_v7 }
 0x107   : > { %715 = vst.msk [vmem:[%s1315_s8 + $0x30] sm:$0xf] %vm702_vm1, %v1090_v26  ;;  %v860_v35 = vsel %vm735_vm2, %v817_v28, 0.0  ;;  %v1091_v45 = vpack.c.bf16 %v499_v33, %v499_v33  ;;  %v761_v46 = vsel %vm735_vm2, %v499_v33, 0.0  ;;  %v818_v47 = vmul.f32 %v499_v33, %v499_v33 }
 0x108   : > { %v763_v48 = vsel %vm735_vm2, %v504_v7, 0.0  ;;  %v861_v49 = vadd.f32 %v860_v35, %v859_v40  ;;  %718 = vst.msk [vmem:[%s1315_s8 + $0x3c] sm:$0xf] %vm702_vm1, %v1093_v41  ;;  %v762_v50 = vadd.f32 %v761_v46, %v760_v39  ;;  %v820_v53 = vmul.f32 %v507_v31, %v507_v31 }
 0x109   : > { %716 = vst.msk [vmem:[%s1315_s8 + $0x34] sm:$0xf] %vm702_vm1, %v1091_v45  ;;  %v862_v54 = vsel %vm735_vm2, %v818_v47, 0.0  ;;  %v531_v56 = vadd.f32 %v1307_v20, %v1361_v4  ;;  %v1098_v60 = vpack.c.bf16 %v528_v51, %v528_v51  ;;  %v864_v63 = vsel %vm735_vm2, %v819_v44, 0.0 }
 0x10a   : > { %v764_v58 = vadd.f32 %v763_v48, %v762_v50  ;;  %v863_v59 = vadd.f32 %v862_v54, %v861_v49  ;;  %v765_v57 = vsel %vm735_vm2, %v507_v31, 0.0  ;;  %v767_v0 = vsel %vm735_vm2, %v1324_v37, 0.0 }
 0x10b   : > { %v1101_v1 = vpack.c.bf16 %v1459_v55, %v1459_v55  ;;  %723 = vst.msk [vmem:[%s1315_s8 + $0x50] sm:$0xf] %vm702_vm1, %v1098_v60  ;;  %v1099_v5 = vpack.c.bf16 %v531_v56, %v531_v56  ;;  %v866_v4 = vsel %vm735_vm2, %v820_v53, 0.0  ;;  %v868_v6 = vsel %vm735_vm2, %v821_v42, 0.0 }
 0x10c   : > { %v865_v62 = vadd.f32 %v864_v63, %v863_v59  ;;  %v766_v3 = vadd.f32 %v765_v57, %v764_v58  ;;  %v822_v7 = vmul.f32 %v1374_v15, %v1374_v15  ;;  %v1479_v37 = vadd.f32 %v1379_v24, %v1307_v20 }
 0x10d   : > { %726 = vst.msk [vmem:[%s1315_s8 + $0x5c] sm:$0xf] %vm702_vm1, %v1101_v1  ;;  %724 = vst.msk [vmem:[%s1315_s8 + $0x54] sm:$0xf] %vm702_vm1, %v1099_v5  ;;  %v544_v11 = vadd.f32 %v1307_v20, %v1385_v29  ;;  %v771_v12 = vsel %vm735_vm2, %v1320_v32, 0.0  ;;  %v823_v13 = vmul.f32 %v1320_v32, %v1320_v32  ;;  %v769_v17 = vsel %vm735_vm2, %v1374_v15, 0.0 }
 0x10e   : > { %v768_v8 = vadd.f32 %v767_v0, %v766_v3  ;;  %v867_v10 = vadd.f32 %v866_v4, %v865_v62  ;;  %v1104_v24 = vpack.c.bf16 %v1479_v37, %v1479_v37  ;;  %v824_v19 = vmul.f32 %v1355_v61, %v1355_v61 }
 0x10f   : > { %v1102_v22 = vpack.c.bf16 %v544_v11, %v544_v11  ;;  %v870_v29 = vsel %vm735_vm2, %v822_v7, 0.0  ;;  %v825_v25 = vmul.f32 %v528_v51, %v528_v51  ;;  %v555_v32 = vadd.f32 %v1393_v36, %v1307_v20 }
 0x110   : > { %v869_v18 = vadd.f32 %v868_v6, %v867_v10  ;;  %v770_v21 = vadd.f32 %v769_v17, %v768_v8  ;;  %729 = vst.msk [vmem:[%s1315_s8 + $0x68] sm:$0xf] %vm702_vm1, %v1104_v24  ;;  %v547_v15 = vadd.f32 %v1307_v20, %v1396_v43  ;;  %v1506_v28 = vadd.f32 %v1411_v2, %v1307_v20 }
 0x111   : > { %727 = vst.msk [vmem:[%s1315_s8 + $0x60] sm:$0xf] %vm702_vm1, %v1102_v22  ;;  %v560_v30 = vadd.f32 %v1307_v20, %v1417_v9  ;;  %v872_v52 = vsel %vm735_vm2, %v823_v13, 0.0  ;;  %v773_v36 = vsel %vm735_vm2, %v1355_v61, 0.0  ;;  %v775_v43 = vsel %vm735_vm2, %v528_v51, 0.0 }
 0x112   : > { %v772_v26 = vadd.f32 %v771_v12, %v770_v21  ;;  %v871_v27 = vadd.f32 %v870_v29, %v869_v18  ;;  %v1105_v31 = vpack.c.bf16 %v555_v32, %v555_v32  ;;  %v1103_v35 = vpack.c.bf16 %v547_v15, %v547_v15 }
 0x113   : > { %v874_v38 = vsel %vm735_vm2, %v824_v19, 0.0  ;;  %v876_v2 = vsel %vm735_vm2, %v825_v25, 0.0  ;;  %v826_v39 = vmul.f32 %v531_v56, %v531_v56  ;;  %v1108_v9 = vpack.c.bf16 %v1506_v28, %v1506_v28 }
 0x114   : > { %v873_v33 = vadd.f32 %v872_v52, %v871_v27  ;;  %v774_v34 = vadd.f32 %v773_v36, %v772_v26  ;;  %730 = vst.msk [vmem:[%s1315_s8 + $0x6c] sm:$0xf] %vm702_vm1, %v1105_v31  ;;  %728 = vst.msk [vmem:[%s1315_s8 + $0x64] sm:$0xf] %vm702_vm1, %v1103_v35  ;;  %v1106_v41 = vpack.c.bf16 %v560_v30, %v560_v30  ;;  %v777_v44 = vsel %vm735_vm2, %v531_v56, 0.0 }
 0x115   : > { %v827_v42 = vmul.f32 %v1425_v14, %v1425_v14  ;;  %733 = vst.msk [vmem:[%s1315_s8 + $0x78] sm:$0xf] %vm702_vm1, %v1108_v9  ;;  %v571_v45 = vadd.f32 %v1427_v16, %v1307_v20  ;;  %v779_v46 = vsel %vm735_vm2, %v1425_v14, 0.0  ;;  %v563_v49 = vadd.f32 %v1307_v20, %v1430_v23 }
 0x116   : > { %v776_v40 = vadd.f32 %v775_v43, %v774_v34  ;;  %v875_v61 = vadd.f32 %v874_v38, %v873_v33  ;;  %731 = vst.msk [vmem:[%s1315_s8 + $0x70] sm:$0xf] %vm702_vm1, %v1106_v41  ;;  %v828_v50 = vmul.f32 %v1459_v55, %v1459_v55  ;;  %v878_v51 = vsel %vm735_vm2, %v826_v39, 0.0 }
 0x117   : > { %v829_v53 = vmul.f32 %v544_v11, %v544_v11  ;;  %v1109_v54 = vpack.c.bf16 %v571_v45, %v571_v45  ;;  %v1107_v58 = vpack.c.bf16 %v563_v49, %v563_v49  ;;  %v880_v14 = vsel %vm735_vm2, %v827_v42, 0.0 }
 0x118   : > { %v877_v47 = vadd.f32 %v876_v2, %v875_v61  ;;  %v778_v48 = vadd.f32 %v777_v44, %v776_v40  ;;  %v781_v59 = vsel %vm735_vm2, %v1459_v55, 0.0  ;;  %v783_v60 = vsel %vm735_vm2, %v544_v11, 0.0 }
 0x119   : > { %734 = vst.msk [vmem:[%s1315_s8 + $0x7c] sm:$0xf] %vm702_vm1, %v1109_v54  ;;  %732 = vst.msk [vmem:[%s1315_s8 + $0x74] sm:$0xf] %vm702_vm1, %v1107_v58  ;;  %v882_v63 = vsel %vm735_vm2, %v828_v50, 0.0  ;;  %v884_v57 = vsel %vm735_vm2, %v829_v53, 0.0  ;;  %v830_v0 = vmul.f32 %v547_v15, %v547_v15  ;;  %v831_v3 = vmul.f32 %v1479_v37, %v1479_v37 }
 0x11a   : > { %v780_v16 = vadd.f32 %v779_v46, %v778_v48  ;;  %v879_v56 = vadd.f32 %v878_v51, %v877_v47  ;;  %v785_v55 = vsel %vm735_vm2, %v547_v15, 0.0  ;;  %v787_v6 = vsel %vm735_vm2, %v1479_v37, 0.0 }
 0x11b   : > { %v832_v7 = vmul.f32 %v555_v32, %v555_v32  ;;  %v886_v8 = vsel %vm735_vm2, %v830_v0, 0.0  ;;  %v833_v10 = vmul.f32 %v560_v30, %v560_v30  ;;  %v888_v13 = vsel %vm735_vm2, %v831_v3, 0.0 }
 0x11c   : > { %v881_v20 = vadd.f32 %v880_v14, %v879_v56  ;;  %v782_v23 = vadd.f32 %v781_v59, %v780_v16  ;;  %v789_v17 = vsel %vm735_vm2, %v555_v32, 0.0  ;;  %v791_v24 = vsel %vm735_vm2, %v560_v30, 0.0 }
 0x11d   : > { %v890_v21 = vsel %vm735_vm2, %v832_v7, 0.0  ;;  %v892_v22 = vsel %vm735_vm2, %v833_v10, 0.0  ;;  %v834_v29 = vmul.f32 %v563_v49, %v563_v49  ;;  %v835_v15 = vmul.f32 %v1506_v28, %v1506_v28 }
 0x11e   : > { %v784_v1 = vadd.f32 %v783_v60, %v782_v23  ;;  %v883_v62 = vadd.f32 %v882_v63, %v881_v20  ;;  %v793_v26 = vsel %vm735_vm2, %v563_v49, 0.0  ;;  %v795_v32 = vsel %vm735_vm2, %v1506_v28, 0.0 }
 0x11f   : > { %v836_v30 = vmul.f32 %v571_v45, %v571_v45  ;;  %v894_v36 = vsel %vm735_vm2, %v834_v29, 0.0  ;;  %v896_v33 = vsel %vm735_vm2, %v835_v15, 0.0  ;;  %v797_v34 = vsel %vm735_vm2, %v571_v45, 0.0 }
 0x120   : > { %v885_v5 = vadd.f32 %v884_v57, %v883_v62  ;;  %v786_v4 = vadd.f32 %v785_v55, %v784_v1 }
 0x121   : > { %v898_v2 = vsel %vm735_vm2, %v836_v30, 0.0 }
 0x122   : > { %v788_v11 = vadd.f32 %v787_v6, %v786_v4  ;;  %v887_v12 = vadd.f32 %v886_v8, %v885_v5 }
 0x124   : > { %v889_v18 = vadd.f32 %v888_v13, %v887_v12  ;;  %v790_v19 = vadd.f32 %v789_v17, %v788_v11 }
 0x126   : > { %v792_v37 = vadd.f32 %v791_v24, %v790_v19  ;;  %v891_v25 = vadd.f32 %v890_v21, %v889_v18 }
 0x128   : > { %v893_v27 = vadd.f32 %v892_v22, %v891_v25  ;;  %v794_v52 = vadd.f32 %v793_v26, %v792_v37 }
 0x12a   : > { %v796_v43 = vadd.f32 %v795_v32, %v794_v52  ;;  %v895_v31 = vadd.f32 %v894_v36, %v893_v27 }
 0x12c   : > { %v798_v35 = vadd.f32 %v797_v34, %v796_v43  ;;  %v897_v38 = vadd.f32 %v896_v33, %v895_v31 }
 0x12e   : > { %v799_v39 = vrot.slane %v798_v35, 4  ;;  %v899_v9 = vadd.f32 %v898_v2, %v897_v38 }
 0x130   : > { %v800_v40 = vadd.f32 %v799_v39, %v798_v35  ;;  %v900_v61 = vrot.slane %v899_v9, 4 }
 0x132   : > { %v801_v28 = vrot.slane %v800_v40, 2  ;;  %v901_v41 = vadd.f32 %v900_v61, %v899_v9 }
 0x134   : > { %v802_v42 = vadd.f32 %v801_v28, %v800_v40  ;;  %v902_v44 = vrot.slane %v901_v41, 2 }
 0x136   : > { %v803_v46 = vrot.slane %v802_v42, 1  ;;  %v903_v47 = vadd.f32 %v902_v44, %v901_v41 }
 0x138   : > { %v904_v48 = vrot.slane %v903_v47, 1  ;;  %v804_v45 = vadd.f32 %v803_v46, %v802_v42 }
 0x13a   : > { %v905_v49 = vadd.f32 %v904_v48, %v903_v47 }
 0x13c   : > { %v907_v50 = vsel %vm906_vm3, %v804_v45, %v905_v49 }
 0x13d   : > { %909 = vst.msk [vmem:[%s211_s12] sm:$0x3] %vm908_vm4, %v907_v50 }
 0x13e PF: > { %s15_s15 = sadd.s32 1, %s1212_s15  }
 0x13f   : > { %p12_p5 = scmp.ge.s32.totalorder %s15_s15, 4  }
 0x141   :  { %14 = sbr.rel (!%p12_p5) target bundleno = 1 (0x1), region = 74 }

// kernel: discriminator_forward.7
= control target key start
LH: loop header
LB: loop body
LE: loop exit
PB: predicated region body
PF: predicated region fallthrough
CT: control target
= control target key end

     0   :  { %s710_s15 = smov 0   ;;  %s809_s0 = inlined_call_operand.vmem [shape: bf16[128,128], index: 0, kind: input, shape index: {}]   ;;  %s810_s1 = inlined_call_operand.vmem [shape: bf16[128,16], index: 1, kind: input, shape index: {}]   ;;  %s811_s2 = inlined_call_operand.vmem [shape: f32[1,16], index: 2, kind: input, shape index: {}]   ;;  %s812_s3 = inlined_call_operand.vmem [shape: bf16[128,16], index: 3, kind: output, shape index: {0}]   ;;  %s813_s4 = inlined_call_operand.vmem [shape: f32[2,2,16], index: 4, kind: output, shape index: {1}]  }
   0x1 LB: > { %s716_s16 = sadd.s32 4294967295, %s683_s15   ;;  %p568_p0 = scmp.ge.s32.totalorder %s683_s15, 1  ;;  %s683_s15 = sphi %s710_s15, %s15_s15  }
   0x2   : > { %p166_p1 = scmp.lt.s32.totalorder %s683_s15, 3 }
   0x4   : > { %p167_p2 = pnand %p568_p0, %p166_p1 }
   0x5   : > { %v665_v0 = vld [vmem:[%s810_s1] sm:$0xff] (!%p167_p2)   ;;  %s569_s19 = sshll.u32 (!%p167_p2), %s716_s16, 3  ;;  %v666_v1 = vld [vmem:[%s810_s1 + $0x8] sm:$0xff] (!%p167_p2)   ;;  %v667_v2 = vld [vmem:[%s810_s1 + $0x10] sm:$0xff] (!%p167_p2)   ;;  %vm413_vm0 = vcmask (!%p167_p2), 125952   ;;  %vm422_vm1 = vcmask (!%p167_p2), 130048  }
   0x6   : > { %170 = sbr.rel (%p167_p2) target bundleno = 286 (0x11e), region = 32  ;;  %p197_p3 = scmp.lt.s32.totalorder (!%p167_p2), %s569_s19, 15  ;;  %617 = vmatprep.subr.bf16.mxu0 (!%p167_p2), %v665_v0  ;;  %641 = vmatprep.subr.bf16.mxu1 (!%p167_p2), %v665_v0  ;;  %v668_v3 = vld [vmem:[%s810_s1 + $0x18] sm:$0xff] (!%p167_p2)   ;;  %v669_v6 = vld [vmem:[%s810_s1 + $0x20] sm:$0xff] (!%p167_p2)   ;;  %v670_v7 = vld [vmem:[%s810_s1 + $0x28] sm:$0xff] (!%p167_p2)   ;;  %vm473_vm2 = vcmask (!%p167_p2), 1040384  }
   0x7   : > { %618 = vmatpush3.bf16.msra.mxu0 (!%p167_p2), %v665_v0  ;;  %649 = vmatpush3.bf16.msra.mxu1 (!%p167_p2), %v665_v0  ;;  %v671_v8 = vld [vmem:[%s810_s1 + $0x30] sm:$0xff] (!%p167_p2)   ;;  %v672_v9 = vld [vmem:[%s810_s1 + $0x38] sm:$0xff] (!%p167_p2)   ;;  %v574_v12 = vld [vmem:[%s811_s2] ss:$0 sm:$0xff] (!%p167_p2)  ;;  %p208_p4 = scmp.lt.s32.totalorder (!%p167_p2), %s716_s16, 1  ;;  %vm475_vm3 = vcmask (!%p167_p2), 123904  }
   0x8   : > { %619 = vmatprep.subr.bf16.mxu0 (!%p167_p2), %v666_v1  ;;  %642 = vmatprep.subr.bf16.mxu1 (!%p167_p2), %v666_v1 }
   0xb   : > { %620 = vmatpush3.bf16.msra.mxu0 (!%p167_p2), %v666_v1  ;;  %650 = vmatpush3.bf16.msra.mxu1 (!%p167_p2), %v666_v1 }
   0xc   : > { %621 = vmatprep.subr.bf16.mxu0 (!%p167_p2), %v667_v2  ;;  %643 = vmatprep.subr.bf16.mxu1 (!%p167_p2), %v667_v2 }
   0xd   : > { %s815_s19 = smov (!%p197_p3, %s569_s19), 15  ;;  %s817_s16 = smov (!%p208_p4, %s716_s16), 1 }
   0xe   : > { %s570_s24 = sshll.u32 %s815_s19, 2  ;;  %s573_s19 = sshll.u32 %s817_s16, 1 }
   0xf   : > { %s738_s27 = scalar_lea.vmem %s809_s0, %s570_s24  ;;  %622 = vmatpush3.bf16.msra.mxu0 %v667_v2  ;;  %651 = vmatpush3.bf16.msra.mxu1 %v667_v2  ;;  %s767_s18 = scalar_lea.vmem %s812_s3, %s570_s24 }
  0x10   : > { %v673_v4 = vld [vmem:[%s738_s27] sm:$0xff]   ;;  %v675_v5 = vld [vmem:[%s738_s27 + $0x10] sm:$0xff]   ;;  %623 = vmatprep.subr.bf16.mxu0 %v668_v3  ;;  %644 = vmatprep.subr.bf16.mxu1 %v668_v3  ;;  %v674_v10 = vld [vmem:[%s738_s27 + $0x8] sm:$0xff]   ;;  %s211_s22 = scalar_lea.vmem %s813_s4, %s573_s19 }
  0x11   : > { %633 = vmatprep.mubr.bf16.mxu0 %v673_v4  ;;  %637 = vmatprep.mubr.bf16.mxu1 %v675_v5  ;;  %v676_v11 = vld [vmem:[%s738_s27 + $0x18] sm:$0xff]  }
  0x13   : > { %624 = vmatpush3.bf16.msra.mxu0 %v668_v3  ;;  %652 = vmatpush3.bf16.msra.mxu1 %v668_v3 }
  0x14   : > { %625 = vmatprep.subr.bf16.mxu0 %v669_v6  ;;  %645 = vmatprep.subr.bf16.mxu1 %v669_v6 }
  0x17   : > { %626 = vmatpush3.bf16.msra.mxu0 %v669_v6  ;;  %653 = vmatpush3.bf16.msra.mxu1 %v669_v6 }
  0x18   : > { %627 = vmatprep.subr.bf16.mxu0 %v670_v7  ;;  %646 = vmatprep.subr.bf16.mxu1 %v670_v7 }
  0x1b   : > { %628 = vmatpush3.bf16.msra.mxu0 %v670_v7  ;;  %654 = vmatpush3.bf16.msra.mxu1 %v670_v7 }
  0x1c   : > { %629 = vmatprep.subr.bf16.mxu0 %v671_v8  ;;  %647 = vmatprep.subr.bf16.mxu1 %v671_v8 }
  0x1f   : > { %630 = vmatpush3.bf16.msra.mxu0 %v671_v8  ;;  %655 = vmatpush3.bf16.msra.mxu1 %v671_v8 }
  0x20   : > { %631 = vmatprep.subr.bf16.mxu0 %v672_v9  ;;  %648 = vmatprep.subr.bf16.mxu1 %v672_v9 }
  0x23   : > { %632 = vmatpush3.bf16.msra.mxu0 %v672_v9  ;;  %656 = vmatpush3.bf16.msra.mxu1 %v672_v9 }
  0x26   : > { %634 = vmatmul.mubr.bf16.vlgmr.msra.gmra.mrb[0].mxu0 %v674_v10  ;;  %638 = vmatmul.mubr.bf16.vlgmr.msra.gmra.mrb[0].mxu1 %v676_v11 }
  0xf9   : > { %v635_v13 = vpop.f32.mrb[0].mxu0  ;;  %v639_v14 = vpop.f32.mrb[0].mxu1 }
  0xfa   : > { %v359_v15 = vadd.f32 %v635_v13, %v574_v12  ;;  %v350_v16 = vpop.f32.mrb[1].mxu0  ;;  %v366_v17 = vpop.f32.mrb[1].mxu1  ;;  %v375_v24 = vadd.f32 %v639_v14, %v574_v12 }
  0xfb   : > { %v351_v18 = vadd.f32 %v574_v12, %v350_v16  ;;  %v636_v19 = vpop.f32.mrb[2].mxu0  ;;  %v640_v20 = vpop.f32.mrb[2].mxu1  ;;  %v367_v29 = vadd.f32 %v574_v12, %v366_v17 }
  0xfc   : > { %v599_v21 = vpack.c.bf16 %v359_v15, %v359_v15  ;;  %v362_v22 = vadd.f32 %v636_v19, %v574_v12  ;;  %v353_v23 = vpop.f32.mrb[3].mxu0  ;;  %v369_v25 = vpop.f32.mrb[3].mxu1  ;;  %v446_v30 = vmul.f32 %v359_v15, %v359_v15  ;;  %v426_v36 = vsel %vm422_vm1, %v359_v15, 0.0 }
  0xfd   : > { %v597_v26 = vpack.c.bf16 %v351_v18, %v351_v18  ;;  %v444_v27 = vmul.f32 %v351_v18, %v351_v18  ;;  %v354_v28 = vadd.f32 %v574_v12, %v353_v23  ;;  %v423_v32 = vsel %vm422_vm1, %v351_v18, 0.0 }
  0xfe   : > { %416 = vst.msk [vmem:[%s767_s18 + $0x8] sm:$0xf] %vm413_vm0, %v599_v21  ;;  %v600_v31 = vpack.c.bf16 %v362_v22, %v362_v22  ;;  %v603_v38 = vpack.c.bf16 %v375_v24, %v375_v24  ;;  %v447_v40 = vmul.f32 %v362_v22, %v362_v22  ;;  %v601_v42 = vpack.c.bf16 %v367_v29, %v367_v29 }
  0xff   : > { %414 = vst.msk [vmem:[%s767_s18] sm:$0xf] %vm413_vm0, %v597_v26  ;;  %v598_v33 = vpack.c.bf16 %v354_v28, %v354_v28  ;;  %v424_v34 = vsel %vm422_vm1, %v354_v28, 0.0  ;;  %v445_v35 = vmul.f32 %v354_v28, %v354_v28  ;;  %v452_v39 = vsel %vm422_vm1, %v444_v27, 0.0 }
 0x100   : > { %417 = vst.msk [vmem:[%s767_s18 + $0xc] sm:$0xf] %vm413_vm0, %v600_v31  ;;  %v425_v37 = vadd.f32 %v424_v34, %v423_v32  ;;  %420 = vst.msk [vmem:[%s767_s18 + $0x18] sm:$0xf] %vm413_vm0, %v603_v38  ;;  %v448_v45 = vmul.f32 %v367_v29, %v367_v29  ;;  %v378_v46 = vadd.f32 %v640_v20, %v574_v12  ;;  %v455_v47 = vsel %vm422_vm1, %v446_v30, 0.0 }
 0x101   : > { %415 = vst.msk [vmem:[%s767_s18 + $0x4] sm:$0xf] %vm413_vm0, %v598_v33  ;;  %v453_v41 = vsel %vm422_vm1, %v445_v35, 0.0  ;;  %v428_v48 = vsel %vm422_vm1, %v362_v22, 0.0  ;;  %418 = vst.msk [vmem:[%s767_s18 + $0x10] sm:$0xf] %vm413_vm0, %v601_v42  ;;  %v370_v50 = vadd.f32 %v574_v12, %v369_v25  ;;  %v450_v60 = vmul.f32 %v375_v24, %v375_v24 }
 0x102   : > { %v427_v43 = vadd.f32 %v426_v36, %v425_v37  ;;  %v454_v44 = vadd.f32 %v453_v41, %v452_v39  ;;  %v430_v49 = vsel %vm422_vm1, %v367_v29, 0.0  ;;  %v604_v53 = vpack.c.bf16 %v378_v46, %v378_v46 }
 0x103   : > { %v457_v54 = vsel %vm422_vm1, %v447_v40, 0.0  ;;  %v459_v55 = vsel %vm422_vm1, %v448_v45, 0.0  ;;  %v602_v56 = vpack.c.bf16 %v370_v50, %v370_v50  ;;  %v449_v59 = vmul.f32 %v370_v50, %v370_v50 }
 0x104   : > { %v456_v51 = vadd.f32 %v455_v47, %v454_v44  ;;  %v429_v52 = vadd.f32 %v428_v48, %v427_v43  ;;  %421 = vst.msk [vmem:[%s767_s18 + $0x1c] sm:$0xf] %vm413_vm0, %v604_v53  ;;  %v432_v61 = vsel %vm422_vm1, %v370_v50, 0.0  ;;  %v434_v0 = vsel %vm422_vm1, %v375_v24, 0.0 }
 0x105   : > { %419 = vst.msk [vmem:[%s767_s18 + $0x14] sm:$0xf] %vm413_vm0, %v602_v56  ;;  %v451_v1 = vmul.f32 %v378_v46, %v378_v46  ;;  %v461_v2 = vsel %vm422_vm1, %v449_v59, 0.0  ;;  %v463_v5 = vsel %vm422_vm1, %v450_v60, 0.0  ;;  %v436_v6 = vsel %vm422_vm1, %v378_v46, 0.0 }
 0x106   : > { %v431_v57 = vadd.f32 %v430_v49, %v429_v52  ;;  %v458_v58 = vadd.f32 %v457_v54, %v456_v51 }
 0x107   : > { %v465_v9 = vsel %vm422_vm1, %v451_v1, 0.0 }
 0x108   : > { %v460_v62 = vadd.f32 %v459_v55, %v458_v58  ;;  %v433_v63 = vadd.f32 %v432_v61, %v431_v57 }
 0x10a   : > { %v435_v3 = vadd.f32 %v434_v0, %v433_v63  ;;  %v462_v4 = vadd.f32 %v461_v2, %v460_v62 }
 0x10c   : > { %v437_v7 = vadd.f32 %v436_v6, %v435_v3  ;;  %v464_v8 = vadd.f32 %v463_v5, %v462_v4 }
 0x10e   : > { %v438_v10 = vrot.slane %v437_v7, 4  ;;  %v466_v11 = vadd.f32 %v465_v9, %v464_v8 }
 0x110   : > { %v439_v12 = vadd.f32 %v438_v10, %v437_v7  ;;  %v467_v13 = vrot.slane %v466_v11, 4 }
 0x112   : > { %v440_v14 = vrot.slane %v439_v12, 2  ;;  %v468_v15 = vadd.f32 %v467_v13, %v466_v11 }
 0x114   : > { %v441_v16 = vadd.f32 %v440_v14, %v439_v12  ;;  %v469_v17 = vrot.slane %v468_v15, 2 }
 0x116   : > { %v442_v18 = vrot.slane %v441_v16, 1  ;;  %v470_v19 = vadd.f32 %v469_v17, %v468_v15 }
 0x118   : > { %v471_v20 = vrot.slane %v470_v19, 1  ;;  %v443_v21 = vadd.f32 %v442_v18, %v441_v16 }
 0x11a   : > { %v472_v22 = vadd.f32 %v471_v20, %v470_v19 }
 0x11c   : > { %v474_v23 = vsel %vm473_vm2, %v443_v21, %v472_v22 }
 0x11d   : > { %476 = vst.msk [vmem:[%s211_s22] sm:$0x3] %vm475_vm3, %v474_v23 }
 0x11e PF: > { %s15_s15 = sadd.s32 1, %s683_s15  }
 0x11f   : > { %p12_p5 = scmp.ge.s32.totalorder %s15_s15, 4  }
 0x121   :  { %14 = sbr.rel (!%p12_p5) target bundleno = 1 (0x1), region = 74 }

// kernel: discriminator_forward.8
= control target key start
LH: loop header
LB: loop body
LE: loop exit
PB: predicated region body
PF: predicated region fallthrough
CT: control target
= control target key end

     0   :  { %s646_s15 = smov 0   ;;  %s726_s0 = inlined_call_operand.vmem [shape: bf16[32,256], index: 0, kind: input, shape index: {}]   ;;  %s727_s1 = inlined_call_operand.vmem [shape: bf16[256,32], index: 1, kind: input, shape index: {}]   ;;  %s728_s2 = inlined_call_operand.vmem [shape: f32[1,32], index: 2, kind: input, shape index: {}]   ;;  %s729_s3 = inlined_call_operand.vmem [shape: bf16[32,32], index: 3, kind: output, shape index: {0}]   ;;  %s730_s4 = inlined_call_operand.vmem [shape: f32[2,2,32], index: 4, kind: output, shape index: {1}]  }
   0x1 LB: > { %s652_s16 = sadd.s32 4294967295, %s619_s15   ;;  %p531_p0 = scmp.ge.s32.totalorder %s619_s15, 1  ;;  %s619_s15 = sphi %s646_s15, %s15_s15  }
   0x2   : > { %p167_p1 = scmp.lt.s32.totalorder %s619_s15, 3 }
   0x4   : > { %p168_p2 = pnand %p531_p0, %p167_p1 }
   0x5   : > { %v594_v0 = vld [vmem:[%s727_s1 + $0x40] sm:$0xff] (!%p168_p2)   ;;  %s532_s19 = sshll.u32 (!%p168_p2), %s652_s16, 1  ;;  %v596_v2 = vld [vmem:[%s727_s1 + $0x48] sm:$0xff] (!%p168_p2)   ;;  %v598_v4 = vld [vmem:[%s727_s1 + $0x50] sm:$0xff] (!%p168_p2)   ;;  %vm412_vm0 = vcmask (!%p168_p2), 257024   ;;  %vm415_vm1 = vcmask (!%p168_p2), 261120  }
   0x6   : > { %171 = sbr.rel (%p168_p2) target bundleno = 276 (0x114), region = 32  ;;  %v595_v1 = vld [vmem:[%s727_s1] sm:$0xff] (!%p168_p2)   ;;  %564 = vmatprep.subr.bf16.mxu0 (!%p168_p2), %v594_v0  ;;  %v597_v3 = vld [vmem:[%s727_s1 + $0x8] sm:$0xff] (!%p168_p2)   ;;  %p199_p3 = scmp.lt.s32.totalorder (!%p168_p2), %s532_s19, 3  ;;  %v599_v5 = vld [vmem:[%s727_s1 + $0x10] sm:$0xff] (!%p168_p2)   ;;  %vm436_vm2 = vcmask (!%p168_p2), 1040384  }
   0x7   : > { %565 = vmatpush3.bf16.msra.mxu0 (!%p168_p2), %v595_v1  ;;  %v600_v6 = vld [vmem:[%s727_s1 + $0x58] sm:$0xff] (!%p168_p2)   ;;  %v602_v8 = vld [vmem:[%s727_s1 + $0x60] sm:$0xff] (!%p168_p2)   ;;  %v604_v10 = vld [vmem:[%s727_s1 + $0x68] sm:$0xff] (!%p168_p2)   ;;  %p211_p4 = scmp.lt.s32.totalorder (!%p168_p2), %s652_s16, 1  ;;  %vm438_vm3 = vcmask (!%p168_p2), 254976  }
   0x8   : > { %566 = vmatprep.subr.bf16.mxu0 (!%p168_p2), %v596_v2  ;;  %v601_v7 = vld [vmem:[%s727_s1 + $0x18] sm:$0xff] (!%p168_p2)   ;;  %v603_v9 = vld [vmem:[%s727_s1 + $0x20] sm:$0xff] (!%p168_p2)   ;;  %v605_v12 = vld [vmem:[%s727_s1 + $0x28] sm:$0xff] (!%p168_p2)  }
   0x9   : > { %v606_v13 = vld [vmem:[%s727_s1 + $0x70] sm:$0xff] (!%p168_p2)   ;;  %v608_v15 = vld [vmem:[%s727_s1 + $0x78] sm:$0xff] (!%p168_p2)   ;;  %v538_v19 = vld [vmem:[%s728_s2] ss:$0 sm:$0xff] (!%p168_p2) }
   0xa   : > { %v607_v14 = vld [vmem:[%s727_s1 + $0x30] sm:$0xff] (!%p168_p2)   ;;  %v609_v16 = vld [vmem:[%s727_s1 + $0x38] sm:$0xff] (!%p168_p2)  }
   0xb   : > { %567 = vmatpush3.bf16.msra.mxu0 (!%p168_p2), %v597_v3 }
   0xc   : > { %568 = vmatprep.subr.bf16.mxu0 (!%p168_p2), %v598_v4 }
   0xd   : > { %s732_s19 = smov (!%p199_p3, %s532_s19), 3  ;;  %s734_s16 = smov (!%p211_p4, %s652_s16), 1 }
   0xe   : > { %s561_s8 = sshll.u32 %s732_s19, 3  ;;  %s536_s7 = sshll.u32 %s732_s19, 2 }
   0xf   : > { %569 = vmatpush3.bf16.msra.mxu0 %v599_v5  ;;  %s203_s13 = scalar_lea.vmem %s726_s0, %s561_s8  ;;  %s209_s10 = scalar_lea.vmem %s729_s3, %s536_s7 }
  0x10   : > { %570 = vmatprep.subr.bf16.mxu0 %v600_v6  ;;  %v612_v11 = vld [vmem:[%s203_s13 + $0x4] ss:$8 sps:$4 sm:$0xff]   ;;  %v610_v17 = vld [vmem:[%s203_s13] ss:$8 sps:$4 sm:$0xff]   ;;  %s537_s19 = sshll.u32 %s734_s16, 1 }
  0x11   : > { %395 = vmatprep.mubr.bf16.mxu0 %v612_v11  ;;  %s214_s13 = scalar_lea.vmem %s730_s4, %s537_s19 }
  0x13   : > { %571 = vmatpush3.bf16.msra.mxu0 %v601_v7 }
  0x14   : > { %572 = vmatprep.subr.bf16.mxu0 %v602_v8 }
  0x17   : > { %573 = vmatpush3.bf16.msra.mxu0 %v603_v9 }
  0x18   : > { %574 = vmatprep.subr.bf16.mxu0 %v604_v10 }
  0x1b   : > { %575 = vmatpush3.bf16.msra.mxu0 %v605_v12 }
  0x1c   : > { %576 = vmatprep.subr.bf16.mxu0 %v606_v13 }
  0x1f   : > { %577 = vmatpush3.bf16.msra.mxu0 %v607_v14 }
  0x20   : > { %578 = vmatprep.subr.bf16.mxu0 %v608_v15 }
  0x23   : > { %579 = vmatpush3.bf16.msra.mxu0 %v609_v16 }
  0x26   : > { %396 = vmatmul.mubr.bf16.vlgmr.msra.gmra.mrb[0].mxu0 %v610_v17 }
  0xf9   : > { %v580_v18 = vpop.f32.mrb[0].mxu0 }
  0xfa   : > { %v581_v20 = vpop.f32.mrb[1].mxu0 }
  0xfb   : > { %v582_v21 = vadd.f32 %v581_v20, %v580_v18  ;;  %v583_v22 = vpop.f32.mrb[2].mxu0 }
  0xfc   : > { %v584_v23 = vpop.f32.mrb[3].mxu0 }
  0xfd   : > { %v398_v24 = vadd.f32 %v582_v21, %v538_v19  ;;  %v585_v25 = vadd.f32 %v584_v23, %v583_v22 }
  0xff   : > { %v562_v26 = vpack.c.bf16 %v398_v24, %v398_v24  ;;  %v425_v27 = vmul.f32 %v398_v24, %v398_v24  ;;  %v401_v28 = vadd.f32 %v585_v25, %v538_v19  ;;  %v416_v29 = vsel %vm415_vm1, %v398_v24, 0.0 }
 0x101   : > { %413 = vst.msk [vmem:[%s209_s10] sm:$0xf] %vm412_vm0, %v562_v26  ;;  %v563_v30 = vpack.c.bf16 %v401_v28, %v401_v28  ;;  %v417_v31 = vsel %vm415_vm1, %v401_v28, 0.0  ;;  %v426_v32 = vmul.f32 %v401_v28, %v401_v28  ;;  %v427_v34 = vsel %vm415_vm1, %v425_v27, 0.0 }
 0x102   : > { %v418_v33 = vadd.f32 %v417_v31, %v416_v29 }
 0x103   : > { %414 = vst.msk [vmem:[%s209_s10 + $0x4] sm:$0xf] %vm412_vm0, %v563_v30  ;;  %v428_v35 = vsel %vm415_vm1, %v426_v32, 0.0 }
 0x104   : > { %v419_v36 = vrot.slane %v418_v33, 4  ;;  %v429_v37 = vadd.f32 %v428_v35, %v427_v34 }
 0x106   : > { %v420_v38 = vadd.f32 %v419_v36, %v418_v33  ;;  %v430_v39 = vrot.slane %v429_v37, 4 }
 0x108   : > { %v421_v40 = vrot.slane %v420_v38, 2  ;;  %v431_v41 = vadd.f32 %v430_v39, %v429_v37 }
 0x10a   : > { %v422_v42 = vadd.f32 %v421_v40, %v420_v38  ;;  %v432_v43 = vrot.slane %v431_v41, 2 }
 0x10c   : > { %v423_v44 = vrot.slane %v422_v42, 1  ;;  %v433_v45 = vadd.f32 %v432_v43, %v431_v41 }
 0x10e   : > { %v434_v46 = vrot.slane %v433_v45, 1  ;;  %v424_v47 = vadd.f32 %v423_v44, %v422_v42 }
 0x110   : > { %v435_v48 = vadd.f32 %v434_v46, %v433_v45 }
 0x112   : > { %v437_v49 = vsel %vm436_vm2, %v424_v47, %v435_v48 }
 0x113   : > { %439 = vst.msk [vmem:[%s214_s13] sm:$0x3] %vm438_vm3, %v437_v49 }
 0x114 PF: > { %s15_s15 = sadd.s32 1, %s619_s15  }
 0x115   : > { %p12_p5 = scmp.ge.s32.totalorder %s15_s15, 4  }
 0x117   :  { %14 = sbr.rel (!%p12_p5) target bundleno = 1 (0x1), region = 74 }

// kernel: discriminator_forward.9
= control target key start
LH: loop header
LB: loop body
LE: loop exit
PB: predicated region body
PF: predicated region fallthrough
CT: control target
= control target key end

     0   :  { %vm382_vm0 = vcmask 7168   ;;  %s637_s1 = inlined_call_operand.vmem [shape: bf16[512,1], index: 1, kind: input, shape index: {}]   ;;  %s638_s0 = inlined_call_operand.vmem [shape: bf16[8,512], index: 0, kind: input, shape index: {}]   ;;  %s639_s2 = inlined_call_operand.<no memory space> [shape: f32[1,1], index: 2, kind: input, shape index: {}]   ;;  %s640_s3 = inlined_call_operand.vmem [shape: f32[8,1], index: 3, kind: output, shape index: {}]  }
   0x1   :  { %v469_v0 = vld [vmem:[%s637_s1 + $0x40] sm:$0xff]   ;;  %v473_v4 = vld [vmem:[%s637_s1 + $0x48] sm:$0xff]   ;;  %v477_v8 = vld [vmem:[%s637_s1 + $0x50] sm:$0xff]   ;;  %v8_v38 = vstv %s639_s2 }
   0x2   :  { %v470_v1 = vld [vmem:[%s637_s1 + $0xc0] sm:$0xff]   ;;  %425 = vmatprep.subr.bf16.mxu0 %v469_v0  ;;  %v474_v5 = vld [vmem:[%s637_s1 + $0xc8] sm:$0xff]   ;;  %v478_v9 = vld [vmem:[%s637_s1 + $0xd0] sm:$0xff]   ;;  %9 = vst [vmem:[#allocation2] sm:$0x1] %v8_v38 }
   0x3   :  { %v471_v2 = vld [vmem:[%s637_s1] sm:$0xff]   ;;  %447 = vmatprep.subr.bf16.mxu1 %v470_v1  ;;  %v475_v6 = vld [vmem:[%s637_s1 + $0x8] sm:$0xff]   ;;  %v479_v10 = vld [vmem:[%s637_s1 + $0x10] sm:$0xff]  }
   0x4   :  { %v472_v3 = vld [vmem:[%s637_s1 + $0x80] sm:$0xff]   ;;  %426 = vmatpush3.bf16.msra.mxu0 %v471_v2  ;;  %v476_v7 = vld [vmem:[%s637_s1 + $0x88] sm:$0xff]   ;;  %v480_v11 = vld [vmem:[%s637_s1 + $0x90] sm:$0xff]  }
   0x5   :  { %448 = vmatpush3.bf16.msra.mxu1 %v472_v3  ;;  %427 = vmatprep.subr.bf16.mxu0 %v473_v4  ;;  %v481_v12 = vld [vmem:[%s637_s1 + $0x58] sm:$0xff]   ;;  %v485_v16 = vld [vmem:[%s637_s1 + $0x60] sm:$0xff]   ;;  %v489_v20 = vld [vmem:[%s637_s1 + $0x68] sm:$0xff]  }
   0x6   :  { %449 = vmatprep.subr.bf16.mxu1 %v474_v5  ;;  %v482_v13 = vld [vmem:[%s637_s1 + $0xd8] sm:$0xff]   ;;  %v486_v17 = vld [vmem:[%s637_s1 + $0xe0] sm:$0xff]   ;;  %v490_v21 = vld [vmem:[%s637_s1 + $0xe8] sm:$0xff]  }
   0x7   :  { %v483_v14 = vld [vmem:[%s637_s1 + $0x18] sm:$0xff]   ;;  %v487_v18 = vld [vmem:[%s637_s1 + $0x20] sm:$0xff]   ;;  %v491_v22 = vld [vmem:[%s637_s1 + $0x28] sm:$0xff]  }
   0x8   :  { %428 = vmatpush3.bf16.msra.mxu0 %v475_v6  ;;  %v484_v15 = vld [vmem:[%s637_s1 + $0x98] sm:$0xff]   ;;  %v488_v19 = vld [vmem:[%s637_s1 + $0xa0] sm:$0xff]   ;;  %v492_v23 = vld [vmem:[%s637_s1 + $0xa8] sm:$0xff]  }
   0x9   :  { %450 = vmatpush3.bf16.msra.mxu1 %v476_v7  ;;  %429 = vmatprep.subr.bf16.mxu0 %v477_v8  ;;  %v493_v24 = vld [vmem:[%s637_s1 + $0x70] sm:$0xff]   ;;  %v497_v28 = vld [vmem:[%s637_s1 + $0x78] sm:$0xff]   ;;  %v17_v32 = vld [vmem:[%s638_s0] sm:$0xff] }
   0xa   :  { %451 = vmatprep.subr.bf16.mxu1 %v478_v9  ;;  %v494_v25 = vld [vmem:[%s637_s1 + $0xf0] sm:$0xff]   ;;  %v498_v29 = vld [vmem:[%s637_s1 + $0xf8] sm:$0xff]   ;;  %v18_v33 = vld [vmem:[%s638_s0 + $0x8] sm:$0xff]  ;;  %v389_v34 = vcombine.low %v17_v32, %v17_v32  ;;  %v390_v35 = vcombine.high %v17_v32, %v17_v32 }
   0xb   :  { %v495_v26 = vld [vmem:[%s637_s1 + $0x30] sm:$0xff]   ;;  %v499_v30 = vld [vmem:[%s637_s1 + $0x38] sm:$0xff]   ;;  %v391_v36 = vcombine.low %v18_v33, %v18_v33  ;;  %v392_v37 = vcombine.high %v18_v33, %v18_v33  ;;  %v388_v41 = vld [vmem:[#allocation2] ss:$0 sm:$0xff] }
   0xc   :  { %430 = vmatpush3.bf16.msra.mxu0 %v479_v10  ;;  %v496_v27 = vld [vmem:[%s637_s1 + $0xb0] sm:$0xff]   ;;  %v500_v31 = vld [vmem:[%s637_s1 + $0xb8] sm:$0xff]   ;;  %328 = vmatprep.mubr.bf16.mxu0 %v390_v35 }
   0xd   :  { %452 = vmatpush3.bf16.msra.mxu1 %v480_v11  ;;  %431 = vmatprep.subr.bf16.mxu0 %v481_v12 }
   0xe   :  { %453 = vmatprep.subr.bf16.mxu1 %v482_v13  ;;  %368 = vmatprep.mubr.bf16.mxu1 %v392_v37 }
  0x10   :  { %432 = vmatpush3.bf16.msra.mxu0 %v483_v14 }
  0x11   :  { %454 = vmatpush3.bf16.msra.mxu1 %v484_v15  ;;  %433 = vmatprep.subr.bf16.mxu0 %v485_v16 }
  0x12   :  { %455 = vmatprep.subr.bf16.mxu1 %v486_v17 }
  0x14   :  { %434 = vmatpush3.bf16.msra.mxu0 %v487_v18 }
  0x15   :  { %456 = vmatpush3.bf16.msra.mxu1 %v488_v19  ;;  %435 = vmatprep.subr.bf16.mxu0 %v489_v20 }
  0x16   :  { %457 = vmatprep.subr.bf16.mxu1 %v490_v21 }
  0x18   :  { %436 = vmatpush3.bf16.msra.mxu0 %v491_v22 }
  0x19   :  { %458 = vmatpush3.bf16.msra.mxu1 %v492_v23  ;;  %437 = vmatprep.subr.bf16.mxu0 %v493_v24 }
  0x1a   :  { %459 = vmatprep.subr.bf16.mxu1 %v494_v25 }
  0x1c   :  { %438 = vmatpush3.bf16.msra.mxu0 %v495_v26 }
  0x1d   :  { %460 = vmatpush3.bf16.msra.mxu1 %v496_v27  ;;  %439 = vmatprep.subr.bf16.mxu0 %v497_v28 }
  0x1e   :  { %461 = vmatprep.subr.bf16.mxu1 %v498_v29 }
  0x20   :  { %440 = vmatpush3.bf16.msra.mxu0 %v499_v30 }
  0x21   :  { %462 = vmatpush3.bf16.msra.mxu1 %v500_v31 }
  0x23   :  { %329 = vmatmul.mubr.bf16.vlgmr.msra.gmra.mrb[0].mxu0 %v389_v34 }
  0x24   :  { %369 = vmatmul.mubr.bf16.vlgmr.msra.gmra.mrb[0].mxu1 %v391_v36 }
  0xf6   :  { %v441_v39 = vpop.f32.mrb[0].mxu0 }
  0xf7   :  { %v463_v40 = vpop.f32.mrb[0].mxu1  ;;  %v442_v42 = vpop.f32.mrb[1].mxu0 }
  0xf8   :  { %v464_v43 = vpop.f32.mrb[1].mxu1  ;;  %v443_v44 = vadd.f32 %v442_v42, %v441_v39  ;;  %v444_v46 = vpop.f32.mrb[2].mxu0 }
  0xf9   :  { %v465_v45 = vadd.f32 %v464_v43, %v463_v40  ;;  %v466_v47 = vpop.f32.mrb[2].mxu1  ;;  %v445_v48 = vpop.f32.mrb[3].mxu0 }
  0xfa   :  { %v467_v49 = vpop.f32.mrb[3].mxu1  ;;  %v331_v50 = vadd.f32 %v443_v44, %v388_v41 }
  0xfc   :  { %v371_v51 = vadd.f32 %v465_v45, %v331_v50 }
  0xfe   :  { %v376_v52 = vsub.f32 0.0, %v371_v51 }
 0x100   :  { %v377_v53 = vmul.f32 1.442695, %v376_v52 }
 0x102   :  { %505 = vpow2.f32 %v377_v53 }
 0x10c   :  { %v506_v54 = vpop.eup %505 }
 0x10d   :  { %v379_v55 = vadd.f32 1.0, %v506_v54 }
 0x10f   :  { %507 = vrcp.f32 %v379_v55 }
 0x119   :  { %v508_v56 = vpop.eup %507 }
 0x11a   :  { %383 = vst.msk [vmem:[%s640_s3] sm:$0xff] %vm382_vm0, %v508_v56 }

</bundles_post_ra>
